<compile_context>
chip_gen: v6e
topology: v6e:2x2x1
jax: 0.10.0
libtpu: 0.0.40
codegen_flags: <defaults>
</compile_context>

<pallas_src>
import math
import functools

import jax
import jax.numpy as jnp
from jax.experimental import pallas as pl
from jax.experimental.pallas import tpu as pltpu


PATCH = 16
IN_FEATURES = 3 * PATCH * PATCH     # 768, hard-coded by the PyTorch module
NUM_PATCHES = 196                   # implied by the (1 + 196) positional table


def _embed_kernel(x_ref, w_ref, posb_ref, o_ref):
    # x_ref:    (rows_pad, 768)   one image's patch rows (row 0 + tail are zeros)
    # w_ref:    (768, d_model)    projection weight, VMEM-resident (constant index)
    # posb_ref: (rows, d_model)   f32: row0 = cls+pos[0]; rows 1..196 = pos[1:]+bias
    # o_ref:    (rows, d_model)
    acc = jnp.dot(x_ref[...], w_ref[...], preferred_element_type=jnp.float32)
    rows = o_ref.shape[0]
    o_ref[...] = (acc[:rows, :] + posb_ref[...]).astype(o_ref.dtype)


def _sublane_multiple(dtype):
    # second-minor block alignment: 8 for f32, 16 for bf16, 32 for int8
    return max(8, 32 // jnp.dtype(dtype).itemsize)


@functools.partial(jax.jit, static_argnames=("compute_dtype",))
def embedded_patches_forward(images, w, b, cls_token, pos_embedding,
                             *, compute_dtype=jnp.bfloat16):
    """images: (B, 3, H, W) -> (B, 1 + (H//16)*(W//16), d_model).

    Matches EmbeddedPatches.forward: unfold into 16x16 patches, linear project
    768 -> d_model, prepend cls token, add positional embedding.
    """
    B, C, H, W_img = images.shape
    d_model = w.shape[1]
    nh, nw = H // PATCH, W_img // PATCH
    P = nh * nw                               # 196 for 224x224
    rows = 1 + P                              # cls row + patch rows (197)
    m_align = _sublane_multiple(compute_dtype)
    rows_pad = pl.cdiv(rows, m_align) * m_align   # 208 (bf16) / 200 (f32)

    # --- patch extraction (== unfold(2).unfold(3).permute(0,2,3,1,4,5).view) ---
    patches = images.reshape(B, C, nh, PATCH, nw, PATCH)
    patches = patches.transpose(0, 2, 4, 1, 3, 5)           # (B, nh, nw, C, ph, pw)
    patches = patches.reshape(B, P, IN_FEATURES)             # (B, 196, 768)
    # Prepend one zero row per image (the cls slot) and zero-pad the tail so the
    # row count is sublane-aligned for the compute dtype.
    patches = jnp.pad(patches, ((0, 0), (1, rows_pad - rows), (0, 0)))
    patches = patches.astype(compute_dtype)                  # (B, rows_pad, 768)

    # Per-row additive term, fused once in the wrapper (tiny, stays resident):
    #   row 0      -> cls_token + pos_embedding[0]   (0 @ W + this == cls + pos)
    #   rows 1..P  -> pos_embedding[1:] + linear bias
    posb = jnp.concatenate(
        [(cls_token[0, 0, :] + pos_embedding[0, 0, :])[None, :],
         pos_embedding[0, 1:rows, :] + b[None, :]],
        axis=0).astype(jnp.float32)                           # (rows, d_model)

    w_c = w.astype(compute_dtype)

    flops = 2 * B * rows_pad * IN_FEATURES * d_model
    bytes_accessed = (B * rows_pad * IN_FEATURES * jnp.dtype(compute_dtype).itemsize
                      + w_c.size * w_c.dtype.itemsize
                      + posb.size * posb.dtype.itemsize
                      + B * rows * d_model * images.dtype.itemsize)

    out = pl.pallas_call(
        _embed_kernel,
        out_shape=jax.ShapeDtypeStruct((B, rows, d_model), images.dtype),
        grid=(B,),                                            # >= 2 parallel steps
        in_specs=[
            # activation tile: one image's padded patch rows per grid step
            pl.BlockSpec((None, rows_pad, IN_FEATURES), lambda i: (i, 0, 0)),
            # projection weight: constant index -> stays resident in VMEM
            pl.BlockSpec((IN_FEATURES, d_model), lambda i: (0, 0)),
            # fused cls/pos/bias table: constant index, full-dim (197) block
            pl.BlockSpec((rows, d_model), lambda i: (0, 0)),
        ],
        # full-dim 197-row, lane-dense output block -> no wrapper slice/concat
        out_specs=pl.BlockSpec((None, rows, d_model), lambda i: (i, 0, 0)),
        compiler_params=pltpu.CompilerParams(
            dimension_semantics=("parallel",),
            vmem_limit_bytes=32 * 1024 * 1024,
            # Let XLA fuse the unfold/transpose/pad/cast chain into the patches
            # operand so the patch tensor never round-trips through HBM.
            allow_input_fusion=[True, False, False],
        ),
        cost_estimate=pl.CostEstimate(
            flops=flops, transcendentals=0, bytes_accessed=bytes_accessed),
    )(patches, w_c, posb)

    return out


if __name__ == "__main__":
    # The module hard-codes 768 input features and a 1+196 positional table,
    # which implies 224x224 RGB images (14x14 patches of 16x16). d_model kept
    # small but lane-dense (multiple of 128).
    B, d_model = 2, 128
    H = W = 14 * PATCH                    # 224

    key = jax.random.PRNGKey(0)
    k_img, k_w, k_b, k_cls, k_pos = jax.random.split(key, 5)

    images = jax.random.normal(k_img, (B, 3, H, W), dtype=jnp.float32)
    bound = math.sqrt(6.0 / (IN_FEATURES + d_model))
    Wp = jax.random.uniform(k_w, (IN_FEATURES, d_model), jnp.float32,
                            minval=-bound, maxval=bound)
    bp = jax.random.uniform(k_b, (d_model,), jnp.float32, minval=-0.01, maxval=0.01)
    # (The PyTorch module initializes cls/pos to zeros; random values give a
    #  stronger correctness check — forward semantics are init-independent.)
    cls_token = 0.02 * jax.random.normal(k_cls, (1, 1, d_model), dtype=jnp.float32)
    pos_embedding = 0.02 * jax.random.normal(k_pos, (1, 1 + NUM_PATCHES, d_model),
                                             dtype=jnp.float32)

    out = embedded_patches_forward(images, Wp, bp, cls_token, pos_embedding)
    jax.block_until_ready(out)

    # Pure-JAX reference: same math as the PyTorch forward. The matmul inputs
    # are cast to the kernel's bf16 compute dtype (f32 accumulation) so the
    # comparison isolates kernel/tiling bugs rather than bf16 input rounding.
    p = images.reshape(B, 3, 14, PATCH, 14, PATCH).transpose(0, 2, 4, 1, 3, 5)
    p = p.reshape(B, NUM_PATCHES, IN_FEATURES)
    ref_emb = jnp.dot(p.astype(jnp.bfloat16), Wp.astype(jnp.bfloat16),
                      preferred_element_type=jnp.float32) + bp
    ref = jnp.concatenate(
        [jnp.broadcast_to(cls_token, (B, 1, d_model)), ref_emb], axis=1) + pos_embedding

    assert out.shape == (B, 1 + NUM_PATCHES, d_model), out.shape
    err = float(jnp.max(jnp.abs(out - ref)))
    assert jnp.allclose(out, ref, atol=5e-3, rtol=5e-3), f"max abs err {err}"

    print("KERNEL_OK")
</pallas_src>

<mosaic_0001>
module attributes {stable_mosaic.version = 11 : i64} {
  func.func @_embed_kernel(%arg0: i32, %arg1: memref<1x208x768xbf16, #tpu.memory_space<vmem>>, %arg2: memref<768x128xbf16, #tpu.memory_space<vmem>>, %arg3: memref<197x128xf32, #tpu.memory_space<vmem>>, %arg4: memref<1x197x128xf32, #tpu.memory_space<vmem>>) attributes {dimension_semantics = [#tpu.dimension_semantics<parallel>], iteration_bounds = array<i64: 2>, scalar_prefetch = 0 : i64, scratch_operands = 0 : i64, tpu.core_type = #tpu.core_type<tc>, window_params = [{transform_indices = @transform_0, window_bounds = array<i64: 1, 208, 768>}, {pipeline_mode = #tpu.pipeline_mode<synchronous>, transform_indices = @transform_1, window_bounds = array<i64: 768, 128>}, {pipeline_mode = #tpu.pipeline_mode<synchronous>, transform_indices = @transform_2, window_bounds = array<i64: 197, 128>}, {transform_indices = @transform_3, window_bounds = array<i64: 1, 197, 128>}]} {
    %c0 = arith.constant 0 : index
    %c0_0 = arith.constant 0 : index
    %c0_1 = arith.constant 0 : index
    %0 = vector.load %arg1[%c0, %c0_0, %c0_1] : memref<1x208x768xbf16, #tpu.memory_space<vmem>>, vector<1x208x768xbf16>
    %1 = vector.shape_cast %0 : vector<1x208x768xbf16> to vector<208x768xbf16>
    %c0_2 = arith.constant 0 : index
    %c0_3 = arith.constant 0 : index
    %2 = vector.load %arg2[%c0_2, %c0_3] : memref<768x128xbf16, #tpu.memory_space<vmem>>, vector<768x128xbf16>
    %cst = arith.constant dense<0.000000e+00> : vector<208x128xf32>
    %3 = tpu.matmul %1, %2, %cst {dimension_numbers = #tpu.dot_dimension_numbers<[1], [0], [0], [1], [0, 0, 1, 1], [], []>} : vector<208x768xbf16>, vector<768x128xbf16>, vector<208x128xf32> -> vector<208x128xf32>
    %4 = vector.extract_strided_slice %3 {offsets = [0, 0], sizes = [197, 128], strides = [1, 1]} : vector<208x128xf32> to vector<197x128xf32>
    %c0_4 = arith.constant 0 : index
    %c0_5 = arith.constant 0 : index
    %5 = vector.load %arg3[%c0_4, %c0_5] : memref<197x128xf32, #tpu.memory_space<vmem>>, vector<197x128xf32>
    %6 = arith.addf %4, %5 : vector<197x128xf32>
    %c0_6 = arith.constant 0 : index
    %c0_7 = arith.constant 0 : index
    %c0_8 = arith.constant 0 : index
    %7 = vector.load %arg4[%c0_6, %c0_7, %c0_8] : memref<1x197x128xf32, #tpu.memory_space<vmem>>, vector<1x197x128xf32>
    %8 = vector.shape_cast %7 : vector<1x197x128xf32> to vector<197x128xf32>
    %9 = vector.shape_cast %6 : vector<197x128xf32> to vector<1x197x128xf32>
    tpu.vector_store %arg4[%c0_6, %c0_7, %c0_8], %9 {strides = array<i32>} : memref<1x197x128xf32, #tpu.memory_space<vmem>>, vector<1x197x128xf32>,
    return
  }
  func.func @transform_0(%arg0: i32) -> (i32, i32, i32) {
    %c0_i32 = arith.constant 0 : i32
    %c0_i32_0 = arith.constant 0 : i32
    %c0_i32_1 = arith.constant 0 : i32
    return %arg0, %c0_i32, %c0_i32_0 : i32, i32, i32
  }
  func.func @transform_1(%arg0: i32) -> (i32, i32) {
    %c0_i32 = arith.constant 0 : i32
    %c0_i32_0 = arith.constant 0 : i32
    %c0_i32_1 = arith.constant 0 : i32
    return %c0_i32, %c0_i32_0 : i32, i32
  }
  func.func @transform_2(%arg0: i32) -> (i32, i32) {
    %c0_i32 = arith.constant 0 : i32
    %c0_i32_0 = arith.constant 0 : i32
    %c0_i32_1 = arith.constant 0 : i32
    return %c0_i32, %c0_i32_0 : i32, i32
  }
  func.func @transform_3(%arg0: i32) -> (i32, i32, i32) {
    %c0_i32 = arith.constant 0 : i32
    %c0_i32_0 = arith.constant 0 : i32
    %c0_i32_1 = arith.constant 0 : i32
    return %arg0, %c0_i32, %c0_i32_0 : i32, i32, i32
  }
}

</mosaic_0001>

<bundles_post_ra>
// kernel: embedded_patches_forward.2
= control target key start
LH: loop header
LB: loop body
LE: loop exit
PB: predicated region body
PF: predicated region fallthrough
CT: control target
= control target key end

     0   :  { %s5359_s17 = smov 0   ;;  %s6396_s0 = inlined_call_operand.vmem [shape: bf16[768,128], index: 0, kind: input, shape index: {}]   ;;  %s6397_s1 = inlined_call_operand.vmem [shape: f32[197,128], index: 1, kind: input, shape index: {}]   ;;  %s6398_s2 = inlined_call_operand.vmem [shape: bf16[2,196,768], index: 2, kind: input, shape index: {}]   ;;  %s6399_s3 = inlined_call_operand.<no memory space> [shape: bf16[], index: 3, kind: input, shape index: {}]   ;;  %s6400_s4 = inlined_call_operand.vmem [shape: f32[2,197,128], index: 4, kind: output, shape index: {}]  }
   0x1   :  { %v9_v0 = vstv %s6399_s3 }
   0x2   :  { %v5357_v1 = vunpack.i.l.bf16 %v9_v0 }
   0x3 LB: > { %s4561_s18 = sadd.s32 4294967295, %s5326_s17   ;;  %p4565_p0 = scmp.ge.s32.totalorder %s5326_s17, 1  ;;  %s5326_s17 = sphi %s5359_s17, %s19_s17  }
   0x4   : > { %p144_p1 = scmp.lt.s32.totalorder %s5326_s17, 3 }
   0x6   : > { %p145_p2 = pnand %p4565_p0, %p144_p1 }
   0x8   : > { %148 = sbr.rel (%p145_p2) target bundleno = 400 (0x190), region = 32 }
   0xd   : > { %v5155_v2 = vld [vmem:[%s6396_s0 + $0x78] sm:$0xff]   ;;  %p169_p3 = scmp.lt.s32.totalorder %s4561_s18, 1  ;;  %v5157_v4 = vld [vmem:[%s6396_s0 + $0x70] sm:$0xff]   ;;  %v5159_v6 = vld [vmem:[%s6396_s0 + $0x68] sm:$0xff]   ;;  %v2819_v11 = vlaneseq  ;;  %vm200_vm0 = vcmask 1046528   ;;  %v5328_v44 = vmov 0.0  }
   0xe   : > { %v5156_v3 = vld [vmem:[%s6396_s0 + $0x38] sm:$0xff]   ;;  %4847 = vmatprep.subr.bf16.mxu0 %v5155_v2  ;;  %5129 = vmatprep.subr.bf16.mxu1 %v5155_v2  ;;  %v5158_v5 = vld [vmem:[%s6396_s0 + $0x30] sm:$0xff]   ;;  %v5160_v7 = vld [vmem:[%s6396_s0 + $0x28] sm:$0xff]  }
   0xf   : > { %4848 = vmatpush3.bf16.msra.mxu0 %v5156_v3  ;;  %5137 = vmatpush3.bf16.msra.mxu1 %v5156_v3  ;;  %s6402_s18 = smov (!%p169_p3, %s4561_s18), 1  ;;  %v5161_v8 = vld [vmem:[%s6396_s0 + $0x60] sm:$0xff]   ;;  %v5163_v10 = vld [vmem:[%s6396_s0 + $0x58] sm:$0xff]   ;;  %v5165_v13 = vld [vmem:[%s6396_s0 + $0x50] sm:$0xff]   ;;  %v5415_v17 = vshrl.u32 %v2819_v11, 7 }
  0x10   : > { %4849 = vmatprep.subr.bf16.mxu0 %v5157_v4  ;;  %5130 = vmatprep.subr.bf16.mxu1 %v5157_v4  ;;  %s4566_s6 = smul.u32 600, %s6402_s18  ;;  %v5162_v9 = vld [vmem:[%s6396_s0 + $0x20] sm:$0xff]   ;;  %v5164_v12 = vld [vmem:[%s6396_s0 + $0x18] sm:$0xff]   ;;  %v5166_v28 = vld [vmem:[%s6396_s0 + $0x10] sm:$0xff]  }
  0x11   : > { %v5167_v33 = vld [vmem:[%s6396_s0 + $0x48] sm:$0xff]   ;;  %v5169_v50 = vld [vmem:[%s6396_s0 + $0x40] sm:$0xff]  }
  0x12   : > { %s5400_s13 = scalar_lea.vmem %s6398_s2, %s4566_s6  ;;  %v5168_v49 = vld [vmem:[%s6396_s0 + $0x8] sm:$0xff]   ;;  %v5170_v59 = vld [vmem:[%s6396_s0] sm:$0xff]  }
  0x13   : > { %4850 = vmatpush3.bf16.msra.mxu0 %v5158_v5  ;;  %5138 = vmatpush3.bf16.msra.mxu1 %v5158_v5  ;;  %v4569_v14 = vld [vmem:[%s5400_s13] sm:$0xff]   ;;  %v5410_v15 = vld [vmem:[%s5400_s13 + $0x18] sm:$0xff]   ;;  %v4653_v22 = vld [vmem:[%s5400_s13 + $0x150] sm:$0xff]  }
  0x14   : > { %4851 = vmatprep.subr.bf16.mxu0 %v5159_v6  ;;  %5131 = vmatprep.subr.bf16.mxu1 %v5159_v6  ;;  %v5413_v16 = vld [vmem:[%s5400_s13 + $0x138] sm:$0xff]   ;;  %v193_v18 = vunpack.c.l.bf16 %v4569_v14  ;;  %v221_v19 = vunpack.c.h.bf16 %v4569_v14  ;;  %v354_v20 = vunpack.c.l.bf16 %v5410_v15  ;;  %v371_v21 = vunpack.c.h.bf16 %v5410_v15  ;;  %v5421_v23 = vld [vmem:[%s5400_s13 + $0x168] sm:$0xff]   ;;  %v4581_v42 = vld [vmem:[%s5400_s13 + $0x30] sm:$0xff]  }
  0x15   : > { %v1578_v24 = vunpack.c.l.bf16 %v5413_v16  ;;  %v1595_v25 = vunpack.c.h.bf16 %v5413_v16  ;;  %v1680_v26 = vunpack.c.l.bf16 %v4653_v22  ;;  %v1697_v27 = vunpack.c.h.bf16 %v4653_v22  ;;  %v5449_v43 = vld [vmem:[%s5400_s13 + $0x48] sm:$0xff]   ;;  %v4665_v0 = vld [vmem:[%s5400_s13 + $0x180] sm:$0xff]   ;;  %v5478_v6 = vld [vmem:[%s5400_s13 + $0x198] sm:$0xff]  }
  0x16   : > { %v201_v29 = vsel %vm200_vm0, %v193_v18, %v5357_v1  ;;  %v229_v30 = vsel %vm200_vm0, %v221_v19, %v5357_v1  ;;  %v362_v31 = vsel %vm200_vm0, %v354_v20, %v193_v18  ;;  %v1782_v32 = vunpack.c.l.bf16 %v5421_v23 }
  0x17   : > { %4852 = vmatpush3.bf16.msra.mxu0 %v5160_v7  ;;  %5139 = vmatpush3.bf16.msra.mxu1 %v5160_v7  ;;  %v202_v34 = vrot.slane %v201_v29, 7  ;;  %v230_v35 = vrot.slane %v229_v30, 7  ;;  %v363_v36 = vrot.slane %v362_v31, 7  ;;  %v379_v37 = vsel %vm200_vm0, %v371_v21, %v221_v19  ;;  %v5177_v7 = vld [vmem:[%s6396_s0 + $0x178] sm:$0xff]   ;;  %v5491_v19 = vld [vmem:[%s5400_s13 + $0x60] sm:$0xff]  }
  0x18   : > { %4853 = vmatprep.subr.bf16.mxu0 %v5161_v8  ;;  %5132 = vmatprep.subr.bf16.mxu1 %v5161_v8  ;;  %v380_v38 = vrot.slane %v379_v37, 7  ;;  %v1688_v39 = vsel %vm200_vm0, %v1680_v26, %v1578_v24  ;;  %v1705_v40 = vsel %vm200_vm0, %v1697_v27, %v1595_v25  ;;  %v1790_v41 = vsel %vm200_vm0, %v1782_v32, %v1680_v26  ;;  %v4677_v37 = vld [vmem:[%s5400_s13 + $0x1b0] sm:$0xff]  }
  0x19   : > { %v203_v45 = vpack.c.bf16 %v5328_v44, %v202_v34  ;;  %v232_v46 = vpack.c.bf16 %v5328_v44, %v230_v35  ;;  %v365_v47 = vpack.c.bf16 %v5328_v44, %v363_v36  ;;  %v1689_v48 = vrot.slane %v1688_v39, 7 }
  0x1a   : > { %v382_v51 = vpack.c.bf16 %v5328_v44, %v380_v38  ;;  %v1706_v52 = vrot.slane %v1705_v40, 7  ;;  %v1791_v53 = vrot.slane %v1790_v41, 7  ;;  %v1799_v54 = vunpack.c.h.bf16 %v5421_v23  ;;  %v5185_v23 = vld [vmem:[%s6396_s0 + $0x170] sm:$0xff]  }
  0x1b   : > { %4854 = vmatpush3.bf16.msra.mxu0 %v5162_v9  ;;  %5140 = vmatpush3.bf16.msra.mxu1 %v5162_v9  ;;  %206 = vst [vmem:[#allocation7] sm:$0xf] %v203_v45  ;;  %235 = vst [vmem:[#allocation7 + $0x4] sm:$0xf] %v232_v46  ;;  %v1691_v55 = vpack.c.bf16 %v5328_v44, %v1689_v48  ;;  %v456_v56 = vunpack.c.l.bf16 %v4581_v42  ;;  %v473_v57 = vunpack.c.h.bf16 %v4581_v42  ;;  %v558_v58 = vunpack.c.l.bf16 %v5449_v43 }
  0x1c   : > { %4855 = vmatprep.subr.bf16.mxu0 %v5163_v10  ;;  %5133 = vmatprep.subr.bf16.mxu1 %v5163_v10  ;;  %368 = vst [vmem:[#allocation7 + $0x18] sm:$0xf] %v365_v47  ;;  %385 = vst [vmem:[#allocation7 + $0x1c] sm:$0xf] %v382_v51  ;;  %v1708_v60 = vpack.c.bf16 %v5328_v44, %v1706_v52  ;;  %v1793_v61 = vpack.c.bf16 %v5328_v44, %v1791_v53  ;;  %v575_v63 = vunpack.c.h.bf16 %v5449_v43  ;;  %v5188_v43 = vld [vmem:[%s6396_s0 + $0x130] sm:$0xff]  }
  0x1d   : > { %v1807_v62 = vsel %vm200_vm0, %v1799_v54, %v1697_v27  ;;  %1694 = vst [vmem:[#allocation7 + $0x150] sm:$0xf] %v1691_v55  ;;  %v464_v3 = vsel %vm200_vm0, %v456_v56, %v354_v20  ;;  %v481_v4 = vsel %vm200_vm0, %v473_v57, %v371_v21  ;;  %v566_v5 = vsel %vm200_vm0, %v558_v58, %v456_v56  ;;  %v5498_v27 = vld [vmem:[%s5400_s13 + $0x78] sm:$0xff]  }
  0x1e   : > { %v1808_v2 = vrot.slane %v1807_v62, 7  ;;  %1711 = vst [vmem:[#allocation7 + $0x154] sm:$0xf] %v1708_v60  ;;  %1796 = vst [vmem:[#allocation7 + $0x168] sm:$0xf] %v1793_v61  ;;  %v465_v8 = vrot.slane %v464_v3, 7  ;;  %v583_v11 = vsel %vm200_vm0, %v575_v63, %v473_v57  ;;  %v1884_v15 = vunpack.c.l.bf16 %v4665_v0 }
  0x1f   : > { %4856 = vmatpush3.bf16.msra.mxu0 %v5164_v12  ;;  %5141 = vmatpush3.bf16.msra.mxu1 %v5164_v12  ;;  %v482_v9 = vrot.slane %v481_v4, 7  ;;  %v567_v10 = vrot.slane %v566_v5, 7  ;;  %v584_v14 = vrot.slane %v583_v11, 7  ;;  %v1901_v18 = vunpack.c.h.bf16 %v4665_v0  ;;  %v5184_v56 = vld [vmem:[%s6396_s0 + $0xb8] sm:$0xff]   ;;  %v5189_v60 = vld [vmem:[%s6396_s0 + $0xf0] sm:$0xff]   ;;  %v5191_v61 = vld [vmem:[%s6396_s0 + $0x168] sm:$0xff]  }
  0x20   : > { %4857 = vmatprep.subr.bf16.mxu0 %v5165_v13  ;;  %5134 = vmatprep.subr.bf16.mxu1 %v5165_v13  ;;  %v1810_v12 = vpack.c.bf16 %v5328_v44, %v1808_v2  ;;  %v5179_v13 = vld [vmem:[%s6396_s0 + $0xf8] sm:$0xff]   ;;  %v467_v20 = vpack.c.bf16 %v5328_v44, %v465_v8  ;;  %v1986_v26 = vunpack.c.l.bf16 %v5478_v6  ;;  %v1892_v30 = vsel %vm200_vm0, %v1884_v15, %v1782_v32  ;;  %v5552_v3 = vld [vmem:[%s5400_s13 + $0x90] sm:$0xff]  }
  0x21   : > { %v484_v21 = vpack.c.bf16 %v5328_v44, %v482_v9  ;;  %v569_v22 = vpack.c.bf16 %v5328_v44, %v567_v10  ;;  %v586_v29 = vpack.c.bf16 %v5328_v44, %v584_v14  ;;  %v1909_v31 = vsel %vm200_vm0, %v1901_v18, %v1799_v54 }
  0x22   : > { %1813 = vst [vmem:[#allocation7 + $0x16c] sm:$0xf] %v1810_v12  ;;  %470 = vst [vmem:[#allocation7 + $0x30] sm:$0xf] %v467_v20  ;;  %v1893_v34 = vrot.slane %v1892_v30, 7  ;;  %v1910_v35 = vrot.slane %v1909_v31, 7  ;;  %v1994_v36 = vsel %vm200_vm0, %v1986_v26, %v1884_v15  ;;  %v660_v32 = vunpack.c.l.bf16 %v5491_v19 }
  0x23   : > { %4858 = vmatpush3.bf16.msra.mxu0 %v5166_v28  ;;  %5142 = vmatpush3.bf16.msra.mxu1 %v5166_v28  ;;  %v5178_v28 = vld [vmem:[%s6396_s0 + $0x138] sm:$0xff]   ;;  %487 = vst [vmem:[#allocation7 + $0x34] sm:$0xf] %v484_v21  ;;  %572 = vst [vmem:[#allocation7 + $0x48] sm:$0xf] %v569_v22  ;;  %v1995_v40 = vrot.slane %v1994_v36, 7  ;;  %v677_v42 = vunpack.c.h.bf16 %v5491_v19  ;;  %v762_v45 = vunpack.c.l.bf16 %v5498_v27  ;;  %v2105_v0 = vunpack.c.h.bf16 %v4677_v37 }
  0x24   : > { %4859 = vmatprep.subr.bf16.mxu0 %v5167_v33  ;;  %5135 = vmatprep.subr.bf16.mxu1 %v5167_v33  ;;  %v2003_v33 = vunpack.c.h.bf16 %v5478_v6  ;;  %v5171_v38 = vld [vmem:[#allocation7] ss:$24 sps:$4 sm:$0xff]   ;;  %v5173_v39 = vld [vmem:[#allocation7 + $0x4] ss:$24 sps:$4 sm:$0xff]   ;;  %589 = vst [vmem:[#allocation7 + $0x4c] sm:$0xf] %v586_v29  ;;  %v1895_v46 = vpack.c.bf16 %v5328_v44, %v1893_v34  ;;  %v1912_v47 = vpack.c.bf16 %v5328_v44, %v1910_v35  ;;  %v881_v29 = vunpack.c.h.bf16 %v5552_v3 }
  0x25   : > { %3895 = vmatprep.mubr.bf16.mxu0 %v5173_v39  ;;  %v1997_v51 = vpack.c.bf16 %v5328_v44, %v1995_v40  ;;  %v685_v53 = vsel %vm200_vm0, %v677_v42, %v575_v63  ;;  %v770_v54 = vsel %vm200_vm0, %v762_v45, %v660_v32  ;;  %v2088_v63 = vunpack.c.l.bf16 %v4677_v37  ;;  %v5174_v4 = vld [vmem:[#allocation7 + $0x150] ss:$24 sps:$4 sm:$0xff]   ;;  %v4689_v35 = vld [vmem:[%s5400_s13 + $0x1e0] sm:$0xff]  }
  0x26   : > { %v2011_v41 = vsel %vm200_vm0, %v2003_v33, %v1901_v18  ;;  %1898 = vst [vmem:[#allocation7 + $0x180] sm:$0xf] %v1895_v46  ;;  %1915 = vst [vmem:[#allocation7 + $0x184] sm:$0xf] %v1912_v47  ;;  %v686_v57 = vrot.slane %v685_v53, 7  ;;  %v5196_v15 = vld [vmem:[%s6396_s0 + $0x128] sm:$0xff]  }
  0x27   : > { %4860 = vmatpush3.bf16.msra.mxu0 %v5168_v49  ;;  %5143 = vmatpush3.bf16.msra.mxu1 %v5168_v49  ;;  %v2012_v48 = vrot.slane %v2011_v41, 7  ;;  %v668_v49 = vsel %vm200_vm0, %v660_v32, %v558_v58  ;;  %v771_v58 = vrot.slane %v770_v54, 7  ;;  %2000 = vst [vmem:[#allocation7 + $0x198] sm:$0xf] %v1997_v51  ;;  %v2096_v12 = vsel %vm200_vm0, %v2088_v63, %v1986_v26  ;;  %v5569_v18 = vld [vmem:[%s5400_s13 + $0xa8] sm:$0xff]   ;;  %v5190_v6 = vld [vmem:[%s6396_s0 + $0xb0] sm:$0xff]  }
  0x28   : > { %4861 = vmatprep.subr.bf16.mxu0 %v5169_v50  ;;  %5136 = vmatprep.subr.bf16.mxu1 %v5169_v50  ;;  %v5526_v50 = vld [vmem:[%s5400_s13 + $0x1c8] sm:$0xff]   ;;  %v669_v52 = vrot.slane %v668_v49, 7  ;;  %v2097_v21 = vrot.slane %v2096_v12, 7  ;;  %v5201_v26 = vld [vmem:[%s6396_s0 + $0x160] sm:$0xff]   ;;  %v966_v37 = vunpack.c.l.bf16 %v5569_v18  ;;  %v983_v49 = vunpack.c.h.bf16 %v5569_v18 }
  0x29   : > { %v2014_v55 = vpack.c.bf16 %v5328_v44, %v2012_v48  ;;  %v2190_v2 = vunpack.c.l.bf16 %v5526_v50  ;;  %v5176_v5 = vld [vmem:[#allocation7 + $0x154] ss:$24 sps:$4 sm:$0xff]   ;;  %v773_v8 = vpack.c.bf16 %v5328_v44, %v771_v58  ;;  %v2207_v10 = vunpack.c.h.bf16 %v5526_v50  ;;  %v5202_v46 = vld [vmem:[%s6396_s0 + $0x120] sm:$0xff]  }
  0x2a   : > { %v671_v62 = vpack.c.bf16 %v5328_v44, %v669_v52  ;;  %3951 = vmatprep.mubr.bf16.mxu1 %v5176_v5  ;;  %v5186_v20 = vld [vmem:[#allocation7 + $0x30] ss:$24 sps:$4 sm:$0xff]   ;;  %v2099_v36 = vpack.c.bf16 %v5328_v44, %v2097_v21  ;;  %v2292_v51 = vunpack.c.l.bf16 %v4689_v35  ;;  %v991_v58 = vsel %vm200_vm0, %v983_v49, %v881_v29  ;;  %v5210_v50 = vld [vmem:[%s6396_s0 + $0xa0] sm:$0xff]  }
  0x2b   : > { %4862 = vmatpush3.bf16.msra.mxu0 %v5170_v59  ;;  %5144 = vmatpush3.bf16.msra.mxu1 %v5170_v59  ;;  %v779_v59 = vunpack.c.h.bf16 %v5498_v27  ;;  %2017 = vst [vmem:[#allocation7 + $0x19c] sm:$0xf] %v2014_v55  ;;  %v2198_v14 = vsel %vm200_vm0, %v2190_v2, %v2088_v63  ;;  %v5180_v19 = vld [vmem:[#allocation7 + $0x34] ss:$24 sps:$4 sm:$0xff]   ;;  %776 = vst [vmem:[#allocation7 + $0x78] sm:$0xf] %v773_v8  ;;  %v2215_v22 = vsel %vm200_vm0, %v2207_v10, %v2105_v0 }
  0x2c   : > { %5035 = vmatprep.subr.bf16.mxu0 %v5177_v7  ;;  %4941 = vmatprep.subr.bf16.mxu1 %v5179_v13  ;;  %v688_v7 = vpack.c.bf16 %v5328_v44, %v686_v57  ;;  %674 = vst [vmem:[#allocation7 + $0x60] sm:$0xf] %v671_v62  ;;  %v2113_v13 = vsel %vm200_vm0, %v2105_v0, %v2003_v33  ;;  %v2199_v33 = vrot.slane %v2198_v14, 7  ;;  %v2216_v34 = vrot.slane %v2215_v22, 7  ;;  %v5199_v27 = vld [vmem:[%s6396_s0 + $0xe8] sm:$0xff]   ;;  %v4617_v8 = vld [vmem:[%s5400_s13 + $0xc0] sm:$0xff]  }
  0x2d   : > { %v787_v9 = vsel %vm200_vm0, %v779_v59, %v677_v42  ;;  %v2114_v31 = vrot.slane %v2113_v13, 7  ;;  %v889_v32 = vsel %vm200_vm0, %v881_v29, %v779_v59  ;;  %2102 = vst [vmem:[#allocation7 + $0x1b0] sm:$0xf] %v2099_v36  ;;  %v2300_v59 = vsel %vm200_vm0, %v2292_v51, %v2190_v2  ;;  %v5209_v2 = vld [vmem:[%s6396_s0 + $0xe0] sm:$0xff]  }
  0x2e   : > { %3896 = vmatmul.mubr.bf16.vlgmr.msra.gmra.mxu0 %v5171_v38  ;;  %v788_v11 = vrot.slane %v787_v9, 7  ;;  %691 = vst [vmem:[#allocation7 + $0x64] sm:$0xf] %v688_v7  ;;  %3952 = vmatmul.mubr.bf16.vlgmr.msra.gmra.mxu1 %v5174_v4  ;;  %v5591_v38 = vld [vmem:[%s5400_s13 + $0x1f8] sm:$0xff]   ;;  %v2201_v40 = vpack.c.bf16 %v5328_v44, %v2199_v33  ;;  %v2218_v41 = vpack.c.bf16 %v5328_v44, %v2216_v34  ;;  %v890_v47 = vrot.slane %v889_v32, 7  ;;  %v5663_v34 = vld [vmem:[%s5400_s13 + $0x228] sm:$0xff]  }
  0x2f   : > { %5036 = vmatpush3.bf16.msra.mxu0 %v5178_v28  ;;  %v864_v28 = vunpack.c.l.bf16 %v5552_v3  ;;  %3903 = vmatprep.mubr.bf16.mxu0 %v5180_v19  ;;  %v2116_v39 = vpack.c.bf16 %v5328_v44, %v2114_v31  ;;  %v5187_v53 = vld [vmem:[#allocation7 + $0x180] ss:$24 sps:$4 sm:$0xff]   ;;  %v992_v63 = vrot.slane %v991_v58, 7  ;;  %v2301_v0 = vrot.slane %v2300_v59, 7  ;;  %v5223_v58 = vld [vmem:[%s6396_s0 + $0x110] sm:$0xff]  }
  0x30   : > { %5037 = vmatprep.subr.bf16.mxu0 %v5185_v23  ;;  %v790_v30 = vpack.c.bf16 %v5328_v44, %v788_v11  ;;  %4942 = vmatpush3.bf16.msra.mxu1 %v5184_v56  ;;  %2204 = vst [vmem:[#allocation7 + $0x1c8] sm:$0xf] %v2201_v40  ;;  %2221 = vst [vmem:[#allocation7 + $0x1cc] sm:$0xf] %v2218_v41  ;;  %v2309_v56 = vunpack.c.h.bf16 %v4689_v35  ;;  %v892_v57 = vpack.c.bf16 %v5328_v44, %v890_v47  ;;  %v5640_v9 = vld [vmem:[%s5400_s13 + $0xd8] sm:$0xff]  }
  0x31   : > { %v872_v23 = vsel %vm200_vm0, %v864_v28, %v762_v45  ;;  %4943 = vmatprep.subr.bf16.mxu1 %v5189_v60  ;;  %v5200_v45 = vld [vmem:[%s6396_s0 + $0xa8] sm:$0xff]   ;;  %v974_v48 = vsel %vm200_vm0, %v966_v37, %v864_v28  ;;  %2119 = vst [vmem:[#allocation7 + $0x1b4] sm:$0xf] %v2116_v39  ;;  %v2411_v60 = vunpack.c.h.bf16 %v5591_v38  ;;  %v994_v11 = vpack.c.bf16 %v5328_v44, %v992_v63  ;;  %v5213_v19 = vld [vmem:[%s6396_s0 + $0xd8] sm:$0xff]  }
  0x32   : > { %793 = vst [vmem:[#allocation7 + $0x7c] sm:$0xf] %v790_v30  ;;  %v873_v42 = vrot.slane %v872_v23, 7  ;;  %v5182_v52 = vld [vmem:[#allocation7 + $0x184] ss:$24 sps:$4 sm:$0xff]   ;;  %v975_v55 = vrot.slane %v974_v48, 7  ;;  %v2317_v3 = vsel %vm200_vm0, %v2309_v56, %v2207_v10  ;;  %v2303_v12 = vpack.c.bf16 %v5328_v44, %v2301_v0 }
  0x33   : > { %5038 = vmatpush3.bf16.msra.mxu0 %v5188_v43  ;;  %v2394_v43 = vunpack.c.l.bf16 %v5591_v38  ;;  %3959 = vmatprep.mubr.bf16.mxu1 %v5182_v52  ;;  %895 = vst [vmem:[#allocation7 + $0x94] sm:$0xf] %v892_v57  ;;  %v2318_v4 = vrot.slane %v2317_v3, 7  ;;  %v2419_v7 = vsel %vm200_vm0, %v2411_v60, %v2309_v56  ;;  %v5643_v10 = vadd.s32 200, %v5415_v17  ;;  %997 = vst [vmem:[#allocation7 + $0xac] sm:$0xf] %v994_v11 }
  0x34   : > { %5039 = vmatprep.subr.bf16.mxu0 %v5191_v61  ;;  %v875_v54 = vpack.c.bf16 %v5328_v44, %v873_v42  ;;  %4944 = vmatpush3.bf16.msra.mxu1 %v5190_v6  ;;  %v5211_v61 = vld [vmem:[%s6396_s0 + $0x158] sm:$0xff]   ;;  %v977_v62 = vpack.c.bf16 %v5328_v44, %v975_v55  ;;  %v2420_v14 = vrot.slane %v2419_v7, 7  ;;  %v1068_v22 = vunpack.c.l.bf16 %v4617_v8  ;;  %2306 = vst [vmem:[#allocation7 + $0x1e0] sm:$0xf] %v2303_v12  ;;  %v4713_v11 = vld [vmem:[%s5400_s13 + $0x240] sm:$0xff]  }
  0x35   : > { %4945 = vmatprep.subr.bf16.mxu1 %v5199_v27  ;;  %v2402_v5 = vsel %vm200_vm0, %v2394_v43, %v2292_v51  ;;  %v5197_v6 = vld [vmem:[#allocation7 + $0x60] ss:$24 sps:$4 sm:$0xff]   ;;  %v2320_v21 = vpack.c.bf16 %v5328_v44, %v2318_v4  ;;  %v1170_v28 = vunpack.c.l.bf16 %v5640_v9  ;;  %v1187_v31 = vunpack.c.h.bf16 %v5640_v9  ;;  %v5222_v51 = vld [vmem:[%s6396_s0 + $0xd0] sm:$0xff]  }
  0x36   : > { %3904 = vmatmul.mubr.bf16.gmra.mxu0 %v5186_v20  ;;  %878 = vst [vmem:[#allocation7 + $0x90] sm:$0xf] %v875_v54  ;;  %3960 = vmatmul.mubr.bf16.gmra.mxu1 %v5187_v53  ;;  %980 = vst [vmem:[#allocation7 + $0xa8] sm:$0xf] %v977_v62  ;;  %v2403_v13 = vrot.slane %v2402_v5, 7  ;;  %v5654_v20 = vld [vmem:[%s5400_s13 + $0x210] sm:$0xff]   ;;  %v2422_v30 = vpack.c.bf16 %v5328_v44, %v2420_v14  ;;  %v1076_v36 = vsel %vm200_vm0, %v1068_v22, %v966_v37 }
  0x37   : > { %5040 = vmatpush3.bf16.msra.mxu0 %v5196_v15  ;;  %v5212_v15 = vld [vmem:[%s6396_s0 + $0x118] sm:$0xff]   ;;  %v2505_v33 = vunpack.c.l.bf16 %v5654_v20  ;;  %2323 = vst [vmem:[#allocation7 + $0x1e4] sm:$0xf] %v2320_v21  ;;  %v1178_v32 = vsel %vm200_vm0, %v1170_v28, %v1068_v22  ;;  %v2531_v39 = vunpack.c.h.bf16 %v5654_v20  ;;  %v5198_v41 = vld [vmem:[#allocation7 + $0x1b0] ss:$24 sps:$4 sm:$0xff]   ;;  %v1077_v27 = vrot.slane %v1076_v36, 7 }
  0x38   : > { %5041 = vmatprep.subr.bf16.mxu0 %v5201_v26  ;;  %4946 = vmatpush3.bf16.msra.mxu1 %v5200_v45  ;;  %v1085_v26 = vunpack.c.h.bf16 %v4617_v8  ;;  %v2405_v29 = vpack.c.bf16 %v5328_v44, %v2403_v13  ;;  %v5194_v35 = vld [vmem:[#allocation7 + $0x1b4] ss:$24 sps:$4 sm:$0xff]   ;;  %v5218_v40 = vld [vmem:[%s6396_s0 + $0x98] sm:$0xff]   ;;  %2425 = vst [vmem:[#allocation7 + $0x1fc] sm:$0xf] %v2422_v30  ;;  %v1179_v42 = vrot.slane %v1178_v32, 7  ;;  %v2687_v57 = vunpack.c.h.bf16 %v5663_v34 }
  0x39   : > { %v5192_v17 = vld [vmem:[#allocation7 + $0x64] ss:$24 sps:$4 sm:$0xff]   ;;  %4947 = vmatprep.subr.bf16.mxu1 %v5209_v2  ;;  %v5221_v45 = vld [vmem:[%s6396_s0 + $0x150] sm:$0xff]   ;;  %3967 = vmatprep.mubr.bf16.mxu1 %v5194_v35  ;;  %v2513_v47 = vsel %vm200_vm0, %v2505_v33, %v2394_v43  ;;  %v2539_v48 = vsel %vm200_vm0, %v2531_v39, %v2411_v60  ;;  %v1079_v52 = vpack.c.bf16 %v5328_v44, %v1077_v27  ;;  %v5716_v8 = vld [vmem:[%s5400_s13 + $0x108] sm:$0xff]   ;;  %vm2822_vm1 = vcmp.lt.s32.totalorder %v5643_v10, 204 }
  0x3a   : > { %3911 = vmatprep.mubr.bf16.mxu0 %v5192_v17  ;;  %v1093_v23 = vsel %vm200_vm0, %v1085_v26, %v983_v49  ;;  %2408 = vst [vmem:[#allocation7 + $0x1f8] sm:$0xf] %v2405_v29  ;;  %v1195_v18 = vsel %vm200_vm0, %v1187_v31, %v1085_v26  ;;  %v2661_v49 = vunpack.c.l.bf16 %v5663_v34  ;;  %v1181_v54 = vpack.c.bf16 %v5328_v44, %v1179_v42  ;;  %v4629_v62 = vld [vmem:[%s5400_s13 + $0xf0] sm:$0xff]   ;;  %v5231_v29 = vld [vmem:[%s6396_s0 + $0xc8] sm:$0xff]   ;;  %v5235_v34 = vld [vmem:[%s6396_s0 + $0xc0] sm:$0xff]  }
  0x3b   : > { %5042 = vmatpush3.bf16.msra.mxu0 %v5202_v46  ;;  %v1094_v37 = vrot.slane %v1093_v23, 7  ;;  %v1196_v46 = vrot.slane %v1195_v18, 7  ;;  %v2514_v55 = vrot.slane %v2513_v47, 7  ;;  %v2540_v56 = vrot.slane %v2539_v48, 7  ;;  %1082 = vst [vmem:[#allocation7 + $0xc0] sm:$0xf] %v1079_v52 }
  0x3c   : > { %5043 = vmatprep.subr.bf16.mxu0 %v5211_v61  ;;  %4948 = vmatpush3.bf16.msra.mxu1 %v5210_v50  ;;  %v2669_v43 = vsel %vm200_vm0, %v2661_v49, %v2505_v33  ;;  %1184 = vst [vmem:[#allocation7 + $0xd8] sm:$0xf] %v1181_v54  ;;  %v5224_v61 = vld [vmem:[%s6396_s0 + $0x90] sm:$0xff]   ;;  %v2695_v2 = vsel %vm200_vm0, %v2687_v57, %v2531_v39  ;;  %v1272_v4 = vunpack.c.l.bf16 %v4629_v62  ;;  %v1289_v5 = vunpack.c.h.bf16 %v4629_v62  ;;  %v5232_v36 = vld [vmem:[%s6396_s0 + $0x88] sm:$0xff]  }
  0x3d   : > { %4949 = vmatprep.subr.bf16.mxu1 %v5213_v19  ;;  %v1096_v53 = vpack.c.bf16 %v5328_v44, %v1094_v37  ;;  %v1198_v38 = vpack.c.bf16 %v5328_v44, %v1196_v46  ;;  %v2516_v59 = vpack.c.bf16 %v5328_v44, %v2514_v55  ;;  %v2670_v60 = vrot.slane %v2669_v43, 7  ;;  %v5203_v63 = vld [vmem:[#allocation7 + $0x94] ss:$24 sps:$4 sm:$0xff]   ;;  %v5207_v0 = vld [vmem:[#allocation7 + $0x90] ss:$24 sps:$4 sm:$0xff]   ;;  %v4641_v43 = vld [vmem:[%s5400_s13 + $0x120] sm:$0xff]  }
  0x3e   : > { %3912 = vmatmul.mubr.bf16.gmra.mxu0 %v5197_v6  ;;  %3968 = vmatmul.mubr.bf16.gmra.mxu1 %v5198_v41  ;;  %v2542_v3 = vpack.c.bf16 %v5328_v44, %v2540_v56  ;;  %v2696_v50 = vrot.slane %v2695_v2, 7  ;;  %v1280_v14 = vsel %vm200_vm0, %v1272_v4, %v1170_v28  ;;  %v1374_v19 = vunpack.c.l.bf16 %v5716_v8  ;;  %v5233_v23 = vld [vmem:[%s6396_s0 + $0x148] sm:$0xff]  }
  0x3f   : > { %5044 = vmatpush3.bf16.msra.mxu0 %v5212_v15  ;;  %1099 = vst [vmem:[#allocation7 + $0xc4] sm:$0xf] %v1096_v53  ;;  %1201 = vst [vmem:[#allocation7 + $0xdc] sm:$0xf] %v1198_v38  ;;  %v2672_v7 = vpack.c.bf16 %v5328_v44, %v2670_v60  ;;  %3919 = vmatprep.mubr.bf16.mxu0 %v5203_v63  ;;  %v5205_v12 = vld [vmem:[#allocation7 + $0x1e4] ss:$24 sps:$4 sm:$0xff]   ;;  %v1297_v15 = vsel %vm200_vm0, %v1289_v5, %v1187_v31  ;;  %v1391_v20 = vunpack.c.h.bf16 %v5716_v8 }
  0x40   : > { %5045 = vmatprep.subr.bf16.mxu0 %v5221_v45  ;;  %4950 = vmatpush3.bf16.msra.mxu1 %v5218_v40  ;;  %2519 = vst [vmem:[#allocation7 + $0x210] sm:$0xf] %v2516_v59  ;;  %2545 = vst [vmem:[#allocation7 + $0x214] sm:$0xf] %v2542_v3  ;;  %v2698_v17 = vpack.c.bf16 %v5328_v44, %v2696_v50  ;;  %v1281_v6 = vrot.slane %v1280_v14, 7  ;;  %v1298_v21 = vrot.slane %v1297_v15, 7  ;;  %v2817_v22 = vunpack.c.l.bf16 %v4713_v11 }
  0x41   : > { %4951 = vmatprep.subr.bf16.mxu1 %v5222_v51  ;;  %v5208_v13 = vld [vmem:[#allocation7 + $0x1e0] ss:$24 sps:$4 sm:$0xff]   ;;  %2675 = vst [vmem:[#allocation7 + $0x228] sm:$0xf] %v2672_v7  ;;  %3975 = vmatprep.mubr.bf16.mxu1 %v5205_v12  ;;  %v1382_v26 = vsel %vm200_vm0, %v1374_v19, %v1272_v4  ;;  %v1399_v9 = vsel %vm200_vm0, %v1391_v20, %v1289_v5  ;;  %v2843_v28 = vunpack.c.h.bf16 %v4713_v11  ;;  %v5234_v51 = vld [vmem:[%s6396_s0 + $0x108] sm:$0xff]   ;;  %v1493_v62 = vunpack.c.h.bf16 %v4641_v43 }
  0x42   : > { %2701 = vst [vmem:[#allocation7 + $0x22c] sm:$0xf] %v2698_v17  ;;  %v1283_v30 = vpack.c.bf16 %v5328_v44, %v1281_v6  ;;  %v1300_v31 = vpack.c.bf16 %v5328_v44, %v1298_v21  ;;  %v1383_v33 = vrot.slane %v1382_v26, 7  ;;  %v1400_v35 = vrot.slane %v1399_v9, 7  ;;  %v5236_v53 = vld [vmem:[%s6396_s0 + $0x80] sm:$0xff]  }
  0x43   : > { %5046 = vmatpush3.bf16.msra.mxu0 %v5223_v58  ;;  %v2823_v32 = vsel %vm2822_vm1, %v2817_v22, %v5357_v1  ;;  %v2849_v39 = vsel %vm2822_vm1, %v2843_v28, %v5357_v1  ;;  %v5219_v41 = vld [vmem:[#allocation7 + $0xc0] ss:$24 sps:$4 sm:$0xff]   ;;  %v1501_v7 = vsel %vm200_vm0, %v1493_v62, %v1391_v20  ;;  %v1603_v11 = vsel %vm200_vm0, %v1595_v25, %v1493_v62  ;;  %v5814_v28 = vld [vmem:[%s5400_s13 + $0x50] sm:$0xff]  }
  0x44   : > { %4952 = vmatpush3.bf16.msra.mxu1 %v5224_v61  ;;  %1286 = vst [vmem:[#allocation7 + $0xf0] sm:$0xf] %v1283_v30  ;;  %1303 = vst [vmem:[#allocation7 + $0xf4] sm:$0xf] %v1300_v31  ;;  %v1385_v27 = vpack.c.bf16 %v5328_v44, %v1383_v33  ;;  %v1402_v37 = vpack.c.bf16 %v5328_v44, %v1400_v35  ;;  %v2825_v42 = vsel %vm200_vm0, %v2823_v32, %v2661_v49  ;;  %v5780_v58 = vld [vmem:[%s5400_s13 + $0x20] sm:$0xff]  }
  0x45   : > { %4953 = vmatprep.subr.bf16.mxu1 %v5231_v29  ;;  %v2851_v18 = vsel %vm200_vm0, %v2849_v39, %v2687_v57  ;;  %v2826_v45 = vrot.slane %v2825_v42, 7  ;;  %v2963_v47 = vsel %vm200_vm0, %v5357_v1, %v2823_v32  ;;  %v2971_v48 = vsel %vm200_vm0, %v5357_v1, %v2849_v39  ;;  %5047 = vmatprep.subr.bf16.mxu0 %v5233_v23  ;;  %v4571_v57 = vld [vmem:[%s5400_s13 + $0x8] sm:$0xff]   ;;  %v5243_v4 = vld [vmem:[%s6396_s0 + $0x140] sm:$0xff]   ;;  %v4573_v39 = vld [vmem:[%s5400_s13 + $0x10] sm:$0xff]  }
  0x46   : > { %3920 = vmatmul.mubr.bf16.gmra.mxu0 %v5207_v0  ;;  %3976 = vmatmul.mubr.bf16.gmra.mxu1 %v5208_v13  ;;  %v5214_v40 = vld [vmem:[#allocation7 + $0xc4] ss:$24 sps:$4 sm:$0xff]   ;;  %v2852_v46 = vrot.slane %v2851_v18, 7  ;;  %1388 = vst [vmem:[#allocation7 + $0x108] sm:$0xf] %v1385_v27  ;;  %v2964_v49 = vrot.slane %v2963_v47, 7  ;;  %v1476_v61 = vunpack.c.l.bf16 %v4641_v43  ;;  %v250_v63 = vunpack.c.l.bf16 %v4571_v57 }
  0x47   : > { %3927 = vmatprep.mubr.bf16.mxu0 %v5214_v40  ;;  %1405 = vst [vmem:[#allocation7 + $0x10c] sm:$0xf] %v1402_v37  ;;  %v2972_v52 = vrot.slane %v2971_v48, 7  ;;  %v2828_v54 = vpack.c.bf16 %v5328_v44, %v2826_v45  ;;  %5048 = vmatpush3.bf16.msra.mxu0 %v5234_v51  ;;  %v279_v0 = vunpack.c.h.bf16 %v4571_v57  ;;  %v388_v3 = vunpack.c.l.bf16 %v5780_v58  ;;  %v5244_v8 = vld [vmem:[%s6396_s0 + $0x100] sm:$0xff]   ;;  %v5820_v40 = vld [vmem:[%s5400_s13 + $0x28] sm:$0xff]  }
  0x48   : > { %4954 = vmatpush3.bf16.msra.mxu1 %v5232_v36  ;;  %v2854_v55 = vpack.c.bf16 %v5328_v44, %v2852_v46  ;;  %v2966_v38 = vpack.c.bf16 %v5328_v44, %v2964_v49  ;;  %v5220_v60 = vld [vmem:[#allocation7 + $0x210] ss:$24 sps:$4 sm:$0xff]   ;;  %v405_v2 = vunpack.c.h.bf16 %v5780_v58  ;;  %v1484_v5 = vsel %vm200_vm0, %v1476_v61, %v1374_v19  ;;  %5049 = vmatprep.subr.bf16.mxu0 %v5243_v4  ;;  %v4583_v19 = vld [vmem:[%s5400_s13 + $0x38] sm:$0xff]  }
  0x49   : > { %4955 = vmatprep.subr.bf16.mxu1 %v5235_v34  ;;  %v2974_v56 = vpack.c.bf16 %v5328_v44, %v2972_v52  ;;  %v5216_v59 = vld [vmem:[#allocation7 + $0x214] ss:$24 sps:$4 sm:$0xff]   ;;  %2831 = vst [vmem:[#allocation7 + $0x240] sm:$0xf] %v2828_v54  ;;  %v1586_v50 = vsel %vm200_vm0, %v1578_v24, %v1476_v61  ;;  %v1485_v12 = vrot.slane %v1484_v5, 7  ;;  %v1502_v13 = vrot.slane %v1501_v7, 7 }
  0x4a   : > { %2857 = vst [vmem:[#allocation7 + $0x244] sm:$0xf] %v2854_v55  ;;  %2969 = vst [vmem:[#allocation7 + $0x258] sm:$0xf] %v2966_v38  ;;  %3983 = vmatprep.mubr.bf16.mxu1 %v5216_v59  ;;  %v1587_v14 = vrot.slane %v1586_v50, 7  ;;  %v1604_v15 = vrot.slane %v1603_v11, 7  ;;  %v258_v24 = vsel %vm200_vm0, %v250_v63, %v5357_v1  ;;  %v287_v16 = vsel %vm200_vm0, %v279_v0, %v5357_v1 }
  0x4b   : > { %2977 = vst [vmem:[#allocation7 + $0x25c] sm:$0xf] %v2974_v56  ;;  %v396_v25 = vsel %vm200_vm0, %v388_v3, %v250_v63  ;;  %v413_v6 = vsel %vm200_vm0, %v405_v2, %v279_v0  ;;  %v1487_v21 = vpack.c.bf16 %v5328_v44, %v1485_v12  ;;  %v1504_v22 = vpack.c.bf16 %v5328_v44, %v1502_v13  ;;  %v4595_v43 = vld [vmem:[%s5400_s13 + $0x68] sm:$0xff]   ;;  %v5838_v61 = vld [vmem:[%s5400_s13 + $0x80] sm:$0xff]  }
  0x4c   : > { %4956 = vmatpush3.bf16.msra.mxu1 %v5236_v53  ;;  %v1589_v26 = vpack.c.bf16 %v5328_v44, %v1587_v14  ;;  %v1606_v9 = vpack.c.bf16 %v5328_v44, %v1604_v15  ;;  %5050 = vmatpush3.bf16.msra.mxu0 %v5244_v8  ;;  %v259_v29 = vrot.slane %v258_v24, 7  ;;  %v288_v30 = vrot.slane %v287_v16, 7  ;;  %v4585_v8 = vld [vmem:[%s5400_s13 + $0x40] sm:$0xff]   ;;  %v5854_v16 = vld [vmem:[%s5400_s13 + $0x58] sm:$0xff]  }
  0x4d   : > { %v5229_v17 = vld [vmem:[#allocation7 + $0xf0] ss:$24 sps:$4 sm:$0xff]   ;;  %v397_v31 = vrot.slane %v396_v25, 7  ;;  %v414_v33 = vrot.slane %v413_v6, 7  ;;  %1490 = vst [vmem:[#allocation7 + $0x120] sm:$0xf] %v1487_v21  ;;  %v490_v35 = vunpack.c.l.bf16 %v4583_v19  ;;  %v507_v36 = vunpack.c.h.bf16 %v4583_v19 }
  0x4e   : > { %3928 = vmatmul.mubr.bf16.gmra.mxu0 %v5219_v41  ;;  %3984 = vmatmul.mubr.bf16.gmra.mxu1 %v5220_v60  ;;  %v5225_v20 = vld [vmem:[#allocation7 + $0xf4] ss:$24 sps:$4 sm:$0xff]   ;;  %1507 = vst [vmem:[#allocation7 + $0x124] sm:$0xf] %v1504_v22  ;;  %1592 = vst [vmem:[#allocation7 + $0x138] sm:$0xf] %v1589_v26  ;;  %v592_v23 = vunpack.c.l.bf16 %v5814_v28  ;;  %v609_v32 = vunpack.c.h.bf16 %v5814_v28  ;;  %v261_v37 = vpack.c.bf16 %v5328_v44, %v259_v29  ;;  %v308_v54 = vunpack.c.l.bf16 %v4573_v39 }
  0x4f   : > { %3935 = vmatprep.mubr.bf16.mxu0 %v5225_v20  ;;  %1609 = vst [vmem:[#allocation7 + $0x13c] sm:$0xf] %v1606_v9  ;;  %v290_v42 = vpack.c.bf16 %v5328_v44, %v288_v30  ;;  %v399_v18 = vpack.c.bf16 %v5328_v44, %v397_v31  ;;  %v416_v45 = vpack.c.bf16 %v5328_v44, %v414_v33  ;;  %v337_v55 = vunpack.c.h.bf16 %v4573_v39 }
  0x50   : > { %v498_v46 = vsel %vm200_vm0, %v490_v35, %v388_v3  ;;  %v515_v47 = vsel %vm200_vm0, %v507_v36, %v405_v2  ;;  %v600_v48 = vsel %vm200_vm0, %v592_v23, %v490_v35  ;;  %v617_v51 = vsel %vm200_vm0, %v609_v32, %v507_v36  ;;  %264 = vst [vmem:[#allocation7 + $0x8] sm:$0xf] %v261_v37  ;;  %v5868_v37 = vld [vmem:[%s5400_s13 + $0xb0] sm:$0xff]  }
  0x51   : > { %v5230_v27 = vld [vmem:[#allocation7 + $0x240] ss:$24 sps:$4 sm:$0xff]   ;;  %293 = vst [vmem:[#allocation7 + $0xc] sm:$0xf] %v290_v42  ;;  %402 = vst [vmem:[#allocation7 + $0x20] sm:$0xf] %v399_v18  ;;  %v422_v38 = vunpack.c.l.bf16 %v5820_v40  ;;  %v439_v56 = vunpack.c.h.bf16 %v5820_v40  ;;  %v316_v62 = vsel %vm200_vm0, %v308_v54, %v5357_v1  ;;  %v345_v63 = vsel %vm200_vm0, %v337_v55, %v5357_v1 }
  0x52   : > { %v5227_v41 = vld [vmem:[#allocation7 + $0x244] ss:$24 sps:$4 sm:$0xff]   ;;  %419 = vst [vmem:[#allocation7 + $0x24] sm:$0xf] %v416_v45  ;;  %v499_v34 = vrot.slane %v498_v46, 7  ;;  %v516_v49 = vrot.slane %v515_v47, 7  ;;  %v694_v7 = vunpack.c.l.bf16 %v4595_v43  ;;  %v711_v50 = vunpack.c.h.bf16 %v4595_v43 }
  0x53   : > { %3991 = vmatprep.mubr.bf16.mxu1 %v5227_v41  ;;  %v601_v52 = vrot.slane %v600_v48, 7  ;;  %v618_v53 = vrot.slane %v617_v51, 7  ;;  %v430_v0 = vsel %vm200_vm0, %v422_v38, %v308_v54  ;;  %v447_v3 = vsel %vm200_vm0, %v439_v56, %v337_v55 }
  0x54   : > { %v501_v57 = vpack.c.bf16 %v5328_v44, %v499_v34  ;;  %v518_v58 = vpack.c.bf16 %v5328_v44, %v516_v49  ;;  %v317_v4 = vrot.slane %v316_v62, 7  ;;  %v346_v5 = vrot.slane %v345_v63, 7 }
  0x55   : > { %v603_v59 = vpack.c.bf16 %v5328_v44, %v601_v52  ;;  %v620_v60 = vpack.c.bf16 %v5328_v44, %v618_v53  ;;  %v5242_v11 = vld [vmem:[#allocation7 + $0x120] ss:$24 sps:$4 sm:$0xff]   ;;  %v431_v12 = vrot.slane %v430_v0, 7  ;;  %v448_v13 = vrot.slane %v447_v3, 7  ;;  %v5884_v0 = vld [vmem:[%s5400_s13 + $0x88] sm:$0xff]  }
  0x56   : > { %3936 = vmatmul.mubr.bf16.gmra.mxu0 %v5229_v17  ;;  %3992 = vmatmul.mubr.bf16.gmra.mxu1 %v5230_v27  ;;  %v5237_v2 = vld [vmem:[#allocation7 + $0x124] ss:$24 sps:$4 sm:$0xff]   ;;  %504 = vst [vmem:[#allocation7 + $0x38] sm:$0xf] %v501_v57  ;;  %521 = vst [vmem:[#allocation7 + $0x3c] sm:$0xf] %v518_v58  ;;  %v796_v14 = vunpack.c.l.bf16 %v5838_v61  ;;  %v813_v15 = vunpack.c.h.bf16 %v5838_v61  ;;  %v319_v19 = vpack.c.bf16 %v5328_v44, %v317_v4  ;;  %v524_v30 = vunpack.c.l.bf16 %v4585_v8 }
  0x57   : > { %606 = vst [vmem:[#allocation7 + $0x50] sm:$0xf] %v603_v59  ;;  %623 = vst [vmem:[#allocation7 + $0x54] sm:$0xf] %v620_v60  ;;  %3943 = vmatprep.mubr.bf16.mxu0 %v5237_v2  ;;  %v348_v20 = vpack.c.bf16 %v5328_v44, %v346_v5  ;;  %v702_v17 = vsel %vm200_vm0, %v694_v7, %v592_v23  ;;  %v719_v24 = vsel %vm200_vm0, %v711_v50, %v609_v32  ;;  %v4607_v32 = vld [vmem:[%s5400_s13 + $0x98] sm:$0xff]  }
  0x58   : > { %v5239_v25 = vld [vmem:[#allocation7 + $0x8] ss:$24 sps:$4 sm:$0xff]   ;;  %v433_v6 = vpack.c.bf16 %v5328_v44, %v431_v12  ;;  %v450_v21 = vpack.c.bf16 %v5328_v44, %v448_v13  ;;  %v703_v22 = vrot.slane %v702_v17, 7  ;;  %v720_v26 = vrot.slane %v719_v24, 7  ;;  %322 = vst [vmem:[#allocation7 + $0x10] sm:$0xf] %v319_v19 }
  0x59   : > { %v5241_v9 = vld [vmem:[#allocation7 + $0xc] ss:$24 sps:$4 sm:$0xff]   ;;  %351 = vst [vmem:[#allocation7 + $0x14] sm:$0xf] %v348_v20  ;;  %v804_v28 = vsel %vm200_vm0, %v796_v14, %v694_v7  ;;  %v821_v29 = vsel %vm200_vm0, %v813_v15, %v711_v50  ;;  %v541_v31 = vunpack.c.h.bf16 %v4585_v8  ;;  %v532_v39 = vsel %vm200_vm0, %v524_v30, %v422_v38  ;;  %v4597_v38 = vld [vmem:[%s5400_s13 + $0x70] sm:$0xff]  }
  0x5a   : > { %436 = vst [vmem:[#allocation7 + $0x28] sm:$0xf] %v433_v6  ;;  %453 = vst [vmem:[#allocation7 + $0x2c] sm:$0xf] %v450_v21  ;;  %v705_v33 = vpack.c.bf16 %v5328_v44, %v703_v22  ;;  %v722_v35 = vpack.c.bf16 %v5328_v44, %v720_v26  ;;  %v805_v36 = vrot.slane %v804_v28, 7  ;;  %v822_v23 = vrot.slane %v821_v29, 7  ;;  %4031 = vmatprep.mubr.bf16.mxu1 %v5241_v9 }
  0x5b   : > { %v549_v40 = vsel %vm200_vm0, %v541_v31, %v439_v56  ;;  %v626_v41 = vunpack.c.l.bf16 %v5854_v16  ;;  %v643_v27 = vunpack.c.h.bf16 %v5854_v16  ;;  %v533_v46 = vrot.slane %v532_v39, 7  ;;  %v5898_v21 = vld [vmem:[%s5400_s13 + $0xe0] sm:$0xff]  }
  0x5c   : > { %708 = vst [vmem:[#allocation7 + $0x68] sm:$0xf] %v705_v33  ;;  %725 = vst [vmem:[#allocation7 + $0x6c] sm:$0xf] %v722_v35  ;;  %v807_v18 = vpack.c.bf16 %v5328_v44, %v805_v36  ;;  %v824_v45 = vpack.c.bf16 %v5328_v44, %v822_v23  ;;  %v550_v47 = vrot.slane %v549_v40, 7  ;;  %v898_v34 = vunpack.c.l.bf16 %v4607_v32  ;;  %v4609_v36 = vld [vmem:[%s5400_s13 + $0xa0] sm:$0xff]  }
  0x5d   : > { %v634_v48 = vsel %vm200_vm0, %v626_v41, %v524_v30  ;;  %v651_v51 = vsel %vm200_vm0, %v643_v27, %v541_v31  ;;  %v915_v49 = vunpack.c.h.bf16 %v4607_v32  ;;  %v535_v52 = vpack.c.bf16 %v5328_v44, %v533_v46 }
  0x5e   : > { %3944 = vmatmul.mubr.bf16.gmra.mxu0 %v5242_v11  ;;  %4032 = vmatmul.mubr.bf16.vlgmr.msra.gmra.mxu1 %v5239_v25  ;;  %v5245_v42 = vld [vmem:[#allocation7 + $0x3c] ss:$24 sps:$4 sm:$0xff]   ;;  %810 = vst [vmem:[#allocation7 + $0x80] sm:$0xf] %v807_v18  ;;  %827 = vst [vmem:[#allocation7 + $0x84] sm:$0xf] %v824_v45  ;;  %v552_v53 = vpack.c.bf16 %v5328_v44, %v550_v47  ;;  %v906_v56 = vsel %vm200_vm0, %v898_v34, %v796_v14  ;;  %v1000_v57 = vunpack.c.l.bf16 %v5868_v37 }
  0x5f   : > { %4039 = vmatprep.mubr.bf16.mxu1 %v5245_v42  ;;  %v635_v54 = vrot.slane %v634_v48, 7  ;;  %v652_v55 = vrot.slane %v651_v51, 7  ;;  %v923_v43 = vsel %vm200_vm0, %v915_v49, %v813_v15  ;;  %v1017_v58 = vunpack.c.h.bf16 %v5868_v37  ;;  %v5250_v59 = vld [vmem:[#allocation7 + $0x38] ss:$24 sps:$4 sm:$0xff]   ;;  %538 = vst [vmem:[#allocation7 + $0x40] sm:$0xf] %v535_v52 }
  0x60   : > { %555 = vst [vmem:[#allocation7 + $0x44] sm:$0xf] %v552_v53  ;;  %v907_v62 = vrot.slane %v906_v56, 7  ;;  %v924_v63 = vrot.slane %v923_v43, 7  ;;  %v1008_v4 = vsel %vm200_vm0, %v1000_v57, %v898_v34  ;;  %v728_v7 = vunpack.c.l.bf16 %v4597_v38  ;;  %v4619_v15 = vld [vmem:[%s5400_s13 + $0xc8] sm:$0xff]   ;;  %v5912_v45 = vld [vmem:[%s5400_s13 + $0xb8] sm:$0xff]  }
  0x61   : > { %v637_v60 = vpack.c.bf16 %v5328_v44, %v635_v54  ;;  %v654_v61 = vpack.c.bf16 %v5328_v44, %v652_v55  ;;  %v5247_v3 = vld [vmem:[#allocation7 + $0x10] ss:$24 sps:$4 sm:$0xff]   ;;  %v5249_v2 = vld [vmem:[#allocation7 + $0x14] ss:$24 sps:$4 sm:$0xff]   ;;  %v1025_v5 = vsel %vm200_vm0, %v1017_v58, %v915_v49  ;;  %v745_v50 = vunpack.c.h.bf16 %v4597_v38  ;;  %v4631_v38 = vld [vmem:[%s5400_s13 + $0xf8] sm:$0xff]  }
  0x62   : > { %v909_v11 = vpack.c.bf16 %v5328_v44, %v907_v62  ;;  %v926_v12 = vpack.c.bf16 %v5328_v44, %v924_v63  ;;  %v1009_v13 = vrot.slane %v1008_v4, 7  ;;  %v1026_v14 = vrot.slane %v1025_v5, 7  ;;  %4167 = vmatprep.mubr.bf16.mxu0 %v5249_v2  ;;  %v5926_v63 = vld [vmem:[%s5400_s13 + $0x110] sm:$0xff]  }
  0x63   : > { %640 = vst [vmem:[#allocation7 + $0x58] sm:$0xf] %v637_v60  ;;  %657 = vst [vmem:[#allocation7 + $0x5c] sm:$0xf] %v654_v61  ;;  %v736_v8 = vsel %vm200_vm0, %v728_v7, %v626_v41  ;;  %v753_v19 = vsel %vm200_vm0, %v745_v50, %v643_v27  ;;  %v830_v20 = vunpack.c.l.bf16 %v5884_v0  ;;  %v847_v17 = vunpack.c.h.bf16 %v5884_v0 }
  0x64   : > { %912 = vst [vmem:[#allocation7 + $0x98] sm:$0xf] %v909_v11  ;;  %929 = vst [vmem:[#allocation7 + $0x9c] sm:$0xf] %v926_v12  ;;  %v1011_v24 = vpack.c.bf16 %v5328_v44, %v1009_v13  ;;  %v1028_v16 = vpack.c.bf16 %v5328_v44, %v1026_v14  ;;  %v737_v25 = vrot.slane %v736_v8, 7  ;;  %v754_v6 = vrot.slane %v753_v19, 7 }
  0x65   : > { %v5251_v22 = vld [vmem:[#allocation7 + $0x6c] ss:$24 sps:$4 sm:$0xff]   ;;  %v838_v26 = vsel %vm200_vm0, %v830_v20, %v728_v7  ;;  %v855_v9 = vsel %vm200_vm0, %v847_v17, %v745_v50  ;;  %v1102_v28 = vunpack.c.l.bf16 %v4619_v15  ;;  %v1119_v29 = vunpack.c.h.bf16 %v4619_v15  ;;  %v5255_v41 = vld [vmem:[#allocation7 + $0x68] ss:$24 sps:$4 sm:$0xff]   ;;  %v4621_v13 = vld [vmem:[%s5400_s13 + $0xd0] sm:$0xff]  }
  0x66   : > { %4040 = vmatmul.mubr.bf16.gmra.mxu1 %v5250_v59  ;;  %4168 = vmatmul.mubr.bf16.vlgmr.msra.gmra.mxu0 %v5247_v3  ;;  %1014 = vst [vmem:[#allocation7 + $0xb0] sm:$0xf] %v1011_v24  ;;  %1031 = vst [vmem:[#allocation7 + $0xb4] sm:$0xf] %v1028_v16  ;;  %v739_v30 = vpack.c.bf16 %v5328_v44, %v737_v25  ;;  %v756_v31 = vpack.c.bf16 %v5328_v44, %v754_v6  ;;  %v839_v33 = vrot.slane %v838_v26, 7  ;;  %v5940_v6 = vld [vmem:[%s5400_s13 + $0xe8] sm:$0xff]  }
  0x67   : > { %v856_v35 = vrot.slane %v855_v9, 7  ;;  %4047 = vmatprep.mubr.bf16.mxu1 %v5251_v22  ;;  %v1110_v23 = vsel %vm200_vm0, %v1102_v28, %v1000_v57  ;;  %v1127_v32 = vsel %vm200_vm0, %v1119_v29, %v1017_v58  ;;  %v1204_v39 = vunpack.c.l.bf16 %v5898_v21 }
  0x68   : > { %v1221_v40 = vunpack.c.h.bf16 %v5898_v21  ;;  %742 = vst [vmem:[#allocation7 + $0x70] sm:$0xf] %v739_v30  ;;  %759 = vst [vmem:[#allocation7 + $0x74] sm:$0xf] %v756_v31  ;;  %v841_v27 = vpack.c.bf16 %v5328_v44, %v839_v33  ;;  %v1111_v42 = vrot.slane %v1110_v23, 7  ;;  %v1128_v18 = vrot.slane %v1127_v32, 7 }
  0x69   : > { %v858_v37 = vpack.c.bf16 %v5328_v44, %v856_v35  ;;  %v1212_v48 = vsel %vm200_vm0, %v1204_v39, %v1102_v28  ;;  %v932_v34 = vunpack.c.l.bf16 %v4609_v36  ;;  %v949_v49 = vunpack.c.h.bf16 %v4609_v36  ;;  %v4643_v36 = vld [vmem:[%s5400_s13 + $0x128] sm:$0xff]  }
  0x6a   : > { %v5253_v46 = vld [vmem:[#allocation7 + $0x44] ss:$24 sps:$4 sm:$0xff]   ;;  %v5256_v47 = vld [vmem:[#allocation7 + $0x40] ss:$24 sps:$4 sm:$0xff]   ;;  %v1229_v51 = vsel %vm200_vm0, %v1221_v40, %v1119_v29  ;;  %844 = vst [vmem:[#allocation7 + $0x88] sm:$0xf] %v841_v27  ;;  %v1113_v52 = vpack.c.bf16 %v5328_v44, %v1111_v42  ;;  %v1130_v53 = vpack.c.bf16 %v5328_v44, %v1128_v18  ;;  %v1034_v57 = vunpack.c.l.bf16 %v5912_v45 }
  0x6b   : > { %861 = vst [vmem:[#allocation7 + $0x8c] sm:$0xf] %v858_v37  ;;  %v1213_v54 = vrot.slane %v1212_v48, 7  ;;  %v1230_v55 = vrot.slane %v1229_v51, 7  ;;  %4175 = vmatprep.mubr.bf16.mxu0 %v5253_v46  ;;  %v940_v56 = vsel %vm200_vm0, %v932_v34, %v830_v20  ;;  %v957_v43 = vsel %vm200_vm0, %v949_v49, %v847_v17  ;;  %v5954_v18 = vld [vmem:[%s5400_s13 + $0x140] sm:$0xff]  }
  0x6c   : > { %v1051_v58 = vunpack.c.h.bf16 %v5912_v45  ;;  %1116 = vst [vmem:[#allocation7 + $0xc8] sm:$0xf] %v1113_v52  ;;  %1133 = vst [vmem:[#allocation7 + $0xcc] sm:$0xf] %v1130_v53  ;;  %v941_v61 = vrot.slane %v940_v56, 7  ;;  %v958_v62 = vrot.slane %v957_v43, 7  ;;  %v1042_v3 = vsel %vm200_vm0, %v1034_v57, %v932_v34 }
  0x6d   : > { %v1215_v59 = vpack.c.bf16 %v5328_v44, %v1213_v54  ;;  %v1232_v60 = vpack.c.bf16 %v5328_v44, %v1230_v55  ;;  %v5257_v0 = vld [vmem:[#allocation7 + $0x9c] ss:$24 sps:$4 sm:$0xff]   ;;  %v1306_v4 = vunpack.c.l.bf16 %v4631_v38  ;;  %v1323_v5 = vunpack.c.h.bf16 %v4631_v38  ;;  %v5261_v20 = vld [vmem:[#allocation7 + $0x98] ss:$24 sps:$4 sm:$0xff]   ;;  %v4633_v54 = vld [vmem:[%s5400_s13 + $0x100] sm:$0xff]  }
  0x6e   : > { %4048 = vmatmul.mubr.bf16.gmra.mxu1 %v5255_v41  ;;  %4176 = vmatmul.mubr.bf16.gmra.mxu0 %v5256_v47  ;;  %v1059_v2 = vsel %vm200_vm0, %v1051_v58, %v949_v49  ;;  %v943_v7 = vpack.c.bf16 %v5328_v44, %v941_v61  ;;  %v960_v50 = vpack.c.bf16 %v5328_v44, %v958_v62  ;;  %v1043_v11 = vrot.slane %v1042_v3, 7  ;;  %v5968_v62 = vld [vmem:[%s5400_s13 + $0x118] sm:$0xff]  }
  0x6f   : > { %1218 = vst [vmem:[#allocation7 + $0xe0] sm:$0xf] %v1215_v59  ;;  %1235 = vst [vmem:[#allocation7 + $0xe4] sm:$0xf] %v1232_v60  ;;  %v1060_v12 = vrot.slane %v1059_v2, 7  ;;  %4055 = vmatprep.mubr.bf16.mxu1 %v5257_v0  ;;  %v1314_v14 = vsel %vm200_vm0, %v1306_v4, %v1204_v39  ;;  %v1331_v15 = vsel %vm200_vm0, %v1323_v5, %v1221_v40  ;;  %v1408_v8 = vunpack.c.l.bf16 %v5926_v63 }
  0x70   : > { %v1425_v19 = vunpack.c.h.bf16 %v5926_v63  ;;  %946 = vst [vmem:[#allocation7 + $0xa0] sm:$0xf] %v943_v7  ;;  %963 = vst [vmem:[#allocation7 + $0xa4] sm:$0xf] %v960_v50  ;;  %v1045_v17 = vpack.c.bf16 %v5328_v44, %v1043_v11  ;;  %v1315_v16 = vrot.slane %v1314_v14, 7  ;;  %v1332_v25 = vrot.slane %v1331_v15, 7 }
  0x71   : > { %v1062_v24 = vpack.c.bf16 %v5328_v44, %v1060_v12  ;;  %v5262_v22 = vld [vmem:[#allocation7 + $0x70] ss:$24 sps:$4 sm:$0xff]   ;;  %v1416_v26 = vsel %vm200_vm0, %v1408_v8, %v1306_v4  ;;  %v1136_v28 = vunpack.c.l.bf16 %v4621_v13  ;;  %v1153_v29 = vunpack.c.h.bf16 %v4621_v13  ;;  %v4655_v13 = vld [vmem:[%s5400_s13 + $0x158] sm:$0xff]  }
  0x72   : > { %v5259_v21 = vld [vmem:[#allocation7 + $0x74] ss:$24 sps:$4 sm:$0xff]   ;;  %v1433_v9 = vsel %vm200_vm0, %v1425_v19, %v1323_v5  ;;  %1048 = vst [vmem:[#allocation7 + $0xb8] sm:$0xf] %v1045_v17  ;;  %v1317_v30 = vpack.c.bf16 %v5328_v44, %v1315_v16  ;;  %v1334_v31 = vpack.c.bf16 %v5328_v44, %v1332_v25  ;;  %v1417_v33 = vrot.slane %v1416_v26, 7 }
  0x73   : > { %1065 = vst [vmem:[#allocation7 + $0xbc] sm:$0xf] %v1062_v24  ;;  %v1434_v35 = vrot.slane %v1433_v9, 7  ;;  %4183 = vmatprep.mubr.bf16.mxu0 %v5259_v21  ;;  %v1144_v23 = vsel %vm200_vm0, %v1136_v28, %v1034_v57  ;;  %v1161_v32 = vsel %vm200_vm0, %v1153_v29, %v1051_v58  ;;  %v1238_v39 = vunpack.c.l.bf16 %v5940_v6  ;;  %v5982_v25 = vld [vmem:[%s5400_s13 + $0x170] sm:$0xff]  }
  0x74   : > { %v1255_v40 = vunpack.c.h.bf16 %v5940_v6  ;;  %1320 = vst [vmem:[#allocation7 + $0xf8] sm:$0xf] %v1317_v30  ;;  %1337 = vst [vmem:[#allocation7 + $0xfc] sm:$0xf] %v1334_v31  ;;  %v1419_v41 = vpack.c.bf16 %v5328_v44, %v1417_v33  ;;  %v1145_v37 = vrot.slane %v1144_v23, 7  ;;  %v1162_v42 = vrot.slane %v1161_v32, 7 }
  0x75   : > { %v1436_v27 = vpack.c.bf16 %v5328_v44, %v1434_v35  ;;  %v1246_v46 = vsel %vm200_vm0, %v1238_v39, %v1136_v28  ;;  %v1510_v48 = vunpack.c.l.bf16 %v4643_v36  ;;  %v1527_v51 = vunpack.c.h.bf16 %v4643_v36  ;;  %v4645_v33 = vld [vmem:[%s5400_s13 + $0x130] sm:$0xff]  }
  0x76   : > { %4056 = vmatmul.mubr.bf16.gmra.mxu1 %v5261_v20  ;;  %4184 = vmatmul.mubr.bf16.gmra.mxu0 %v5262_v22  ;;  %v5263_v45 = vld [vmem:[#allocation7 + $0xcc] ss:$24 sps:$4 sm:$0xff]   ;;  %v1263_v47 = vsel %vm200_vm0, %v1255_v40, %v1153_v29  ;;  %1422 = vst [vmem:[#allocation7 + $0x110] sm:$0xf] %v1419_v41  ;;  %v1147_v34 = vpack.c.bf16 %v5328_v44, %v1145_v37  ;;  %v1247_v52 = vrot.slane %v1246_v46, 7  ;;  %v1612_v56 = vunpack.c.l.bf16 %v5954_v18 }
  0x77   : > { %1439 = vst [vmem:[#allocation7 + $0x114] sm:$0xf] %v1436_v27  ;;  %v1164_v49 = vpack.c.bf16 %v5328_v44, %v1162_v42  ;;  %v1264_v53 = vrot.slane %v1263_v47, 7  ;;  %4063 = vmatprep.mubr.bf16.mxu1 %v5263_v45  ;;  %v1518_v55 = vsel %vm200_vm0, %v1510_v48, %v1408_v8  ;;  %v1535_v38 = vsel %vm200_vm0, %v1527_v51, %v1425_v19  ;;  %v5267_v57 = vld [vmem:[#allocation7 + $0xc8] ss:$24 sps:$4 sm:$0xff]  }
  0x78   : > { %v1629_v43 = vunpack.c.h.bf16 %v5954_v18  ;;  %1150 = vst [vmem:[#allocation7 + $0xd0] sm:$0xf] %v1147_v34  ;;  %v1249_v58 = vpack.c.bf16 %v5328_v44, %v1247_v52  ;;  %v1519_v60 = vrot.slane %v1518_v55, 7  ;;  %v1536_v61 = vrot.slane %v1535_v38, 7  ;;  %v5996_v42 = vld [vmem:[%s5400_s13 + $0x148] sm:$0xff]  }
  0x79   : > { %1167 = vst [vmem:[#allocation7 + $0xd4] sm:$0xf] %v1164_v49  ;;  %v1266_v59 = vpack.c.bf16 %v5328_v44, %v1264_v53  ;;  %v5268_v0 = vld [vmem:[#allocation7 + $0xa0] ss:$24 sps:$4 sm:$0xff]   ;;  %v1620_v3 = vsel %vm200_vm0, %v1612_v56, %v1510_v48  ;;  %v1340_v4 = vunpack.c.l.bf16 %v4633_v54  ;;  %v1357_v5 = vunpack.c.h.bf16 %v4633_v54  ;;  %v4667_v54 = vld [vmem:[%s5400_s13 + $0x188] sm:$0xff]  }
  0x7a   : > { %v5265_v63 = vld [vmem:[#allocation7 + $0xa4] ss:$24 sps:$4 sm:$0xff]   ;;  %v1637_v2 = vsel %vm200_vm0, %v1629_v43, %v1527_v51  ;;  %1252 = vst [vmem:[#allocation7 + $0xe8] sm:$0xf] %v1249_v58  ;;  %v1521_v7 = vpack.c.bf16 %v5328_v44, %v1519_v60  ;;  %v1538_v50 = vpack.c.bf16 %v5328_v44, %v1536_v61  ;;  %v1621_v11 = vrot.slane %v1620_v3, 7 }
  0x7b   : > { %1269 = vst [vmem:[#allocation7 + $0xec] sm:$0xf] %v1266_v59  ;;  %v1638_v12 = vrot.slane %v1637_v2, 7  ;;  %4191 = vmatprep.mubr.bf16.mxu0 %v5265_v63  ;;  %v1348_v14 = vsel %vm200_vm0, %v1340_v4, %v1238_v39  ;;  %v1365_v15 = vsel %vm200_vm0, %v1357_v5, %v1255_v40  ;;  %v1442_v8 = vunpack.c.l.bf16 %v5968_v62  ;;  %v6010_v61 = vld [vmem:[%s5400_s13 + $0x1a0] sm:$0xff]  }
  0x7c   : > { %v1459_v19 = vunpack.c.h.bf16 %v5968_v62  ;;  %1524 = vst [vmem:[#allocation7 + $0x128] sm:$0xf] %v1521_v7  ;;  %1541 = vst [vmem:[#allocation7 + $0x12c] sm:$0xf] %v1538_v50  ;;  %v1623_v20 = vpack.c.bf16 %v5328_v44, %v1621_v11  ;;  %v1349_v24 = vrot.slane %v1348_v14, 7  ;;  %v1366_v16 = vrot.slane %v1365_v15, 7 }
  0x7d   : > { %v1640_v17 = vpack.c.bf16 %v5328_v44, %v1638_v12  ;;  %v1450_v21 = vsel %vm200_vm0, %v1442_v8, %v1340_v4  ;;  %v1714_v26 = vunpack.c.l.bf16 %v4655_v13  ;;  %v1731_v9 = vunpack.c.h.bf16 %v4655_v13  ;;  %v5273_v39 = vld [vmem:[#allocation7 + $0xf8] ss:$24 sps:$4 sm:$0xff]   ;;  %v4657_v11 = vld [vmem:[%s5400_s13 + $0x160] sm:$0xff]  }
  0x7e   : > { %4064 = vmatmul.mubr.bf16.gmra.mxu1 %v5267_v57  ;;  %4192 = vmatmul.mubr.bf16.gmra.mxu0 %v5268_v0  ;;  %v5269_v6 = vld [vmem:[#allocation7 + $0xfc] ss:$24 sps:$4 sm:$0xff]   ;;  %v1467_v22 = vsel %vm200_vm0, %v1459_v19, %v1357_v5  ;;  %1626 = vst [vmem:[#allocation7 + $0x140] sm:$0xf] %v1623_v20  ;;  %v1351_v28 = vpack.c.bf16 %v5328_v44, %v1349_v24  ;;  %v1451_v30 = vrot.slane %v1450_v21, 7  ;;  %v1816_v23 = vunpack.c.l.bf16 %v5982_v25 }
  0x7f   : > { %1643 = vst [vmem:[#allocation7 + $0x144] sm:$0xf] %v1640_v17  ;;  %v1368_v29 = vpack.c.bf16 %v5328_v44, %v1366_v16  ;;  %v1468_v31 = vrot.slane %v1467_v22, 7  ;;  %4071 = vmatprep.mubr.bf16.mxu1 %v5269_v6  ;;  %v1722_v35 = vsel %vm200_vm0, %v1714_v26, %v1612_v56  ;;  %v1739_v36 = vsel %vm200_vm0, %v1731_v9, %v1629_v43  ;;  %v6024_v16 = vld [vmem:[%s5400_s13 + $0x178] sm:$0xff]  }
  0x80   : > { %v1833_v32 = vunpack.c.h.bf16 %v5982_v25  ;;  %1354 = vst [vmem:[#allocation7 + $0x100] sm:$0xf] %v1351_v28  ;;  %v1453_v40 = vpack.c.bf16 %v5328_v44, %v1451_v30  ;;  %v1723_v27 = vrot.slane %v1722_v35, 7  ;;  %v1740_v37 = vrot.slane %v1739_v36, 7 }
  0x81   : > { %1371 = vst [vmem:[#allocation7 + $0x104] sm:$0xf] %v1368_v29  ;;  %v1470_v41 = vpack.c.bf16 %v5328_v44, %v1468_v31  ;;  %v5274_v45 = vld [vmem:[#allocation7 + $0xd0] ss:$24 sps:$4 sm:$0xff]   ;;  %v1824_v46 = vsel %vm200_vm0, %v1816_v23, %v1714_v26  ;;  %v1544_v48 = vunpack.c.l.bf16 %v4645_v33  ;;  %v1561_v51 = vunpack.c.h.bf16 %v4645_v33  ;;  %v4679_v33 = vld [vmem:[%s5400_s13 + $0x1b8] sm:$0xff]  }
  0x82   : > { %v5271_v18 = vld [vmem:[#allocation7 + $0xd4] ss:$24 sps:$4 sm:$0xff]   ;;  %v1841_v47 = vsel %vm200_vm0, %v1833_v32, %v1731_v9  ;;  %1456 = vst [vmem:[#allocation7 + $0x118] sm:$0xf] %v1453_v40  ;;  %v1725_v34 = vpack.c.bf16 %v5328_v44, %v1723_v27  ;;  %v1742_v49 = vpack.c.bf16 %v5328_v44, %v1740_v37  ;;  %v1825_v52 = vrot.slane %v1824_v46, 7 }
  0x83   : > { %1473 = vst [vmem:[#allocation7 + $0x11c] sm:$0xf] %v1470_v41  ;;  %v1842_v53 = vrot.slane %v1841_v47, 7  ;;  %4199 = vmatprep.mubr.bf16.mxu0 %v5271_v18  ;;  %v1552_v55 = vsel %vm200_vm0, %v1544_v48, %v1442_v8  ;;  %v1569_v38 = vsel %vm200_vm0, %v1561_v51, %v1459_v19  ;;  %v1646_v56 = vunpack.c.l.bf16 %v5996_v42  ;;  %v6038_v37 = vld [vmem:[%s5400_s13 + $0x1d0] sm:$0xff]  }
  0x84   : > { %v1663_v43 = vunpack.c.h.bf16 %v5996_v42  ;;  %1728 = vst [vmem:[#allocation7 + $0x158] sm:$0xf] %v1725_v34  ;;  %1745 = vst [vmem:[#allocation7 + $0x15c] sm:$0xf] %v1742_v49  ;;  %v1827_v57 = vpack.c.bf16 %v5328_v44, %v1825_v52  ;;  %v1553_v59 = vrot.slane %v1552_v55, 7  ;;  %v1570_v60 = vrot.slane %v1569_v38, 7 }
  0x85   : > { %v1844_v58 = vpack.c.bf16 %v5328_v44, %v1842_v53  ;;  %v1654_v63 = vsel %vm200_vm0, %v1646_v56, %v1544_v48  ;;  %v1918_v3 = vunpack.c.l.bf16 %v4667_v54  ;;  %v1935_v2 = vunpack.c.h.bf16 %v4667_v54  ;;  %v5279_v8 = vld [vmem:[#allocation7 + $0x128] ss:$24 sps:$4 sm:$0xff]   ;;  %v4669_v52 = vld [vmem:[%s5400_s13 + $0x190] sm:$0xff]  }
  0x86   : > { %4072 = vmatmul.mubr.bf16.gmra.mxu1 %v5273_v39  ;;  %4200 = vmatmul.mubr.bf16.gmra.mxu0 %v5274_v45  ;;  %v5275_v62 = vld [vmem:[#allocation7 + $0x12c] ss:$24 sps:$4 sm:$0xff]   ;;  %v1671_v0 = vsel %vm200_vm0, %v1663_v43, %v1561_v51  ;;  %1830 = vst [vmem:[#allocation7 + $0x170] sm:$0xf] %v1827_v57  ;;  %v1555_v4 = vpack.c.bf16 %v5328_v44, %v1553_v59  ;;  %v1655_v7 = vrot.slane %v1654_v63, 7  ;;  %v2020_v14 = vunpack.c.l.bf16 %v6010_v61 }
  0x87   : > { %1847 = vst [vmem:[#allocation7 + $0x174] sm:$0xf] %v1844_v58  ;;  %v1572_v5 = vpack.c.bf16 %v5328_v44, %v1570_v60  ;;  %v1672_v50 = vrot.slane %v1671_v0, 7  ;;  %4079 = vmatprep.mubr.bf16.mxu1 %v5275_v62  ;;  %v1926_v12 = vsel %vm200_vm0, %v1918_v3, %v1816_v23  ;;  %v1943_v13 = vsel %vm200_vm0, %v1935_v2, %v1833_v32  ;;  %v6052_v60 = vld [vmem:[%s5400_s13 + $0x1a8] sm:$0xff]  }
  0x88   : > { %v2037_v15 = vunpack.c.h.bf16 %v6010_v61  ;;  %1558 = vst [vmem:[#allocation7 + $0x130] sm:$0xf] %v1555_v4  ;;  %v1657_v19 = vpack.c.bf16 %v5328_v44, %v1655_v7  ;;  %v1927_v17 = vrot.slane %v1926_v12, 7  ;;  %v1944_v24 = vrot.slane %v1943_v13, 7 }
  0x89   : > { %1575 = vst [vmem:[#allocation7 + $0x134] sm:$0xf] %v1572_v5  ;;  %v1674_v20 = vpack.c.bf16 %v5328_v44, %v1672_v50  ;;  %v5280_v6 = vld [vmem:[#allocation7 + $0x100] ss:$24 sps:$4 sm:$0xff]   ;;  %v2028_v21 = vsel %vm200_vm0, %v2020_v14, %v1918_v3  ;;  %v1748_v26 = vunpack.c.l.bf16 %v4657_v11  ;;  %v1765_v9 = vunpack.c.h.bf16 %v4657_v11  ;;  %v4691_v11 = vld [vmem:[%s5400_s13 + $0x1e8] sm:$0xff]  }
  0x8a   : > { %v5277_v25 = vld [vmem:[#allocation7 + $0x104] ss:$24 sps:$4 sm:$0xff]   ;;  %v2045_v22 = vsel %vm200_vm0, %v2037_v15, %v1935_v2  ;;  %1660 = vst [vmem:[#allocation7 + $0x148] sm:$0xf] %v1657_v19  ;;  %v1929_v28 = vpack.c.bf16 %v5328_v44, %v1927_v17  ;;  %v1946_v29 = vpack.c.bf16 %v5328_v44, %v1944_v24  ;;  %v2029_v30 = vrot.slane %v2028_v21, 7 }
  0x8b   : > { %1677 = vst [vmem:[#allocation7 + $0x14c] sm:$0xf] %v1674_v20  ;;  %v2046_v31 = vrot.slane %v2045_v22, 7  ;;  %4207 = vmatprep.mubr.bf16.mxu0 %v5277_v25  ;;  %v1756_v35 = vsel %vm200_vm0, %v1748_v26, %v1646_v56  ;;  %v1773_v36 = vsel %vm200_vm0, %v1765_v9, %v1663_v43  ;;  %v1850_v23 = vunpack.c.l.bf16 %v6024_v16  ;;  %v6066_v24 = vld [vmem:[%s5400_s13 + $0x200] sm:$0xff]  }
  0x8c   : > { %v1867_v32 = vunpack.c.h.bf16 %v6024_v16  ;;  %1932 = vst [vmem:[#allocation7 + $0x188] sm:$0xf] %v1929_v28  ;;  %1949 = vst [vmem:[#allocation7 + $0x18c] sm:$0xf] %v1946_v29  ;;  %v2031_v39 = vpack.c.bf16 %v5328_v44, %v2029_v30  ;;  %v1757_v41 = vrot.slane %v1756_v35, 7  ;;  %v1774_v27 = vrot.slane %v1773_v36, 7 }
  0x8d   : > { %v2048_v40 = vpack.c.bf16 %v5328_v44, %v2046_v31  ;;  %v1858_v18 = vsel %vm200_vm0, %v1850_v23, %v1748_v26  ;;  %v2122_v46 = vunpack.c.l.bf16 %v4679_v33  ;;  %v2139_v47 = vunpack.c.h.bf16 %v4679_v33  ;;  %v5285_v56 = vld [vmem:[#allocation7 + $0x158] ss:$24 sps:$4 sm:$0xff]   ;;  %v4681_v30 = vld [vmem:[%s5400_s13 + $0x1c0] sm:$0xff]  }
  0x8e   : > { %4080 = vmatmul.mubr.bf16.gmra.mxu1 %v5279_v8  ;;  %4208 = vmatmul.mubr.bf16.gmra.mxu0 %v5280_v6  ;;  %v5281_v42 = vld [vmem:[#allocation7 + $0x15c] ss:$24 sps:$4 sm:$0xff]   ;;  %v1875_v45 = vsel %vm200_vm0, %v1867_v32, %v1765_v9  ;;  %2034 = vst [vmem:[#allocation7 + $0x1a0] sm:$0xf] %v2031_v39  ;;  %v1759_v48 = vpack.c.bf16 %v5328_v44, %v1757_v41  ;;  %v1859_v34 = vrot.slane %v1858_v18, 7  ;;  %v2224_v55 = vunpack.c.l.bf16 %v6038_v37 }
  0x8f   : > { %2051 = vst [vmem:[#allocation7 + $0x1a4] sm:$0xf] %v2048_v40  ;;  %v1776_v51 = vpack.c.bf16 %v5328_v44, %v1774_v27  ;;  %v1876_v49 = vrot.slane %v1875_v45, 7  ;;  %4087 = vmatprep.mubr.bf16.mxu1 %v5281_v42  ;;  %v2130_v53 = vsel %vm200_vm0, %v2122_v46, %v2020_v14  ;;  %v2147_v54 = vsel %vm200_vm0, %v2139_v47, %v2037_v15  ;;  %v6080_v27 = vld [vmem:[%s5400_s13 + $0x1d8] sm:$0xff]  }
  0x90   : > { %v2241_v38 = vunpack.c.h.bf16 %v6038_v37  ;;  %1762 = vst [vmem:[#allocation7 + $0x160] sm:$0xf] %v1759_v48  ;;  %v1861_v43 = vpack.c.bf16 %v5328_v44, %v1859_v34  ;;  %v2131_v58 = vrot.slane %v2130_v53, 7  ;;  %v2148_v59 = vrot.slane %v2147_v54, 7 }
  0x91   : > { %1779 = vst [vmem:[#allocation7 + $0x164] sm:$0xf] %v1776_v51  ;;  %v1878_v57 = vpack.c.bf16 %v5328_v44, %v1876_v49  ;;  %v5286_v62 = vld [vmem:[#allocation7 + $0x130] ss:$24 sps:$4 sm:$0xff]   ;;  %v2232_v63 = vsel %vm200_vm0, %v2224_v55, %v2122_v46  ;;  %v1952_v3 = vunpack.c.l.bf16 %v4669_v52  ;;  %v1969_v2 = vunpack.c.h.bf16 %v4669_v52  ;;  %v4703_v52 = vld [vmem:[%s5400_s13 + $0x218] sm:$0xff]  }
  0x92   : > { %v5283_v61 = vld [vmem:[#allocation7 + $0x134] ss:$24 sps:$4 sm:$0xff]   ;;  %v2249_v0 = vsel %vm200_vm0, %v2241_v38, %v2139_v47  ;;  %1864 = vst [vmem:[#allocation7 + $0x178] sm:$0xf] %v1861_v43  ;;  %v2133_v4 = vpack.c.bf16 %v5328_v44, %v2131_v58  ;;  %v2150_v5 = vpack.c.bf16 %v5328_v44, %v2148_v59  ;;  %v2233_v7 = vrot.slane %v2232_v63, 7 }
  0x93   : > { %1881 = vst [vmem:[#allocation7 + $0x17c] sm:$0xf] %v1878_v57  ;;  %v2250_v50 = vrot.slane %v2249_v0, 7  ;;  %4215 = vmatprep.mubr.bf16.mxu0 %v5283_v61  ;;  %v1960_v12 = vsel %vm200_vm0, %v1952_v3, %v1850_v23  ;;  %v1977_v13 = vsel %vm200_vm0, %v1969_v2, %v1867_v32  ;;  %v2054_v14 = vunpack.c.l.bf16 %v6052_v60  ;;  %v6094_v59 = vld [vmem:[%s5400_s13 + $0x230] sm:$0xff]  }
  0x94   : > { %v2071_v15 = vunpack.c.h.bf16 %v6052_v60  ;;  %2136 = vst [vmem:[#allocation7 + $0x1b8] sm:$0xf] %v2133_v4  ;;  %2153 = vst [vmem:[#allocation7 + $0x1bc] sm:$0xf] %v2150_v5  ;;  %v2235_v8 = vpack.c.bf16 %v5328_v44, %v2233_v7  ;;  %v1961_v20 = vrot.slane %v1960_v12, 7  ;;  %v1978_v17 = vrot.slane %v1977_v13, 7 }
  0x95   : > { %v2252_v19 = vpack.c.bf16 %v5328_v44, %v2250_v50  ;;  %v2062_v25 = vsel %vm200_vm0, %v2054_v14, %v1952_v3  ;;  %v2326_v21 = vunpack.c.l.bf16 %v4691_v11  ;;  %v2343_v22 = vunpack.c.h.bf16 %v4691_v11  ;;  %v5291_v23 = vld [vmem:[#allocation7 + $0x188] ss:$24 sps:$4 sm:$0xff]   ;;  %v4693_v7 = vld [vmem:[%s5400_s13 + $0x1f0] sm:$0xff]  }
  0x96   : > { %4088 = vmatmul.mubr.bf16.gmra.mxu1 %v5285_v56  ;;  %4216 = vmatmul.mubr.bf16.gmra.mxu0 %v5286_v62  ;;  %v5287_v16 = vld [vmem:[#allocation7 + $0x18c] ss:$24 sps:$4 sm:$0xff]   ;;  %v2079_v6 = vsel %vm200_vm0, %v2071_v15, %v1969_v2  ;;  %2238 = vst [vmem:[#allocation7 + $0x1d0] sm:$0xf] %v2235_v8  ;;  %v1963_v26 = vpack.c.bf16 %v5328_v44, %v1961_v20  ;;  %v2063_v28 = vrot.slane %v2062_v25, 7  ;;  %v2428_v35 = vunpack.c.l.bf16 %v6066_v24 }
  0x97   : > { %2255 = vst [vmem:[#allocation7 + $0x1d4] sm:$0xf] %v2252_v19  ;;  %v1980_v9 = vpack.c.bf16 %v5328_v44, %v1978_v17  ;;  %v2080_v29 = vrot.slane %v2079_v6, 7  ;;  %4095 = vmatprep.mubr.bf16.mxu1 %v5287_v16  ;;  %v2334_v31 = vsel %vm200_vm0, %v2326_v21, %v2224_v55  ;;  %v2351_v33 = vsel %vm200_vm0, %v2343_v22, %v2241_v38  ;;  %v6108_v17 = vld [vmem:[%s5400_s13 + $0x208] sm:$0xff]  }
  0x98   : > { %v2445_v36 = vunpack.c.h.bf16 %v6066_v24  ;;  %1966 = vst [vmem:[#allocation7 + $0x190] sm:$0xf] %v1963_v26  ;;  %v2065_v32 = vpack.c.bf16 %v5328_v44, %v2063_v28  ;;  %v2335_v40 = vrot.slane %v2334_v31, 7  ;;  %v2352_v41 = vrot.slane %v2351_v33, 7 }
  0x99   : > { %1983 = vst [vmem:[#allocation7 + $0x194] sm:$0xf] %v1980_v9  ;;  %v2082_v39 = vpack.c.bf16 %v5328_v44, %v2080_v29  ;;  %v5292_v42 = vld [vmem:[#allocation7 + $0x160] ss:$24 sps:$4 sm:$0xff]   ;;  %v2436_v18 = vsel %vm200_vm0, %v2428_v35, %v2326_v21  ;;  %v2156_v46 = vunpack.c.l.bf16 %v4681_v30  ;;  %v2173_v47 = vunpack.c.h.bf16 %v4681_v30  ;;  %v4715_v30 = vld [vmem:[%s5400_s13 + $0x248] sm:$0xff]  }
  0x9a   : > { %v5289_v37 = vld [vmem:[#allocation7 + $0x164] ss:$24 sps:$4 sm:$0xff]   ;;  %v2453_v45 = vsel %vm200_vm0, %v2445_v36, %v2343_v22  ;;  %2068 = vst [vmem:[#allocation7 + $0x1a8] sm:$0xf] %v2065_v32  ;;  %v2337_v48 = vpack.c.bf16 %v5328_v44, %v2335_v40  ;;  %v2354_v51 = vpack.c.bf16 %v5328_v44, %v2352_v41  ;;  %v2437_v34 = vrot.slane %v2436_v18, 7 }
  0x9b   : > { %2085 = vst [vmem:[#allocation7 + $0x1ac] sm:$0xf] %v2082_v39  ;;  %v2454_v49 = vrot.slane %v2453_v45, 7  ;;  %4223 = vmatprep.mubr.bf16.mxu0 %v5289_v37  ;;  %v2164_v53 = vsel %vm200_vm0, %v2156_v46, %v2054_v14  ;;  %v2181_v54 = vsel %vm200_vm0, %v2173_v47, %v2071_v15  ;;  %v2258_v55 = vunpack.c.l.bf16 %v6080_v27  ;;  %v4705_v41 = vld [vmem:[%s5400_s13 + $0x220] sm:$0xff]  }
  0x9c   : > { %v2275_v38 = vunpack.c.h.bf16 %v6080_v27  ;;  %2340 = vst [vmem:[#allocation7 + $0x1e8] sm:$0xf] %v2337_v48  ;;  %2357 = vst [vmem:[#allocation7 + $0x1ec] sm:$0xf] %v2354_v51  ;;  %v2439_v56 = vpack.c.bf16 %v5328_v44, %v2437_v34  ;;  %v2165_v57 = vrot.slane %v2164_v53, 7  ;;  %v2182_v58 = vrot.slane %v2181_v54, 7 }
  0x9d   : > { %v2456_v43 = vpack.c.bf16 %v5328_v44, %v2454_v49  ;;  %v2266_v61 = vsel %vm200_vm0, %v2258_v55, %v2156_v46  ;;  %v2557_v63 = vunpack.c.l.bf16 %v4703_v52  ;;  %v2583_v0 = vunpack.c.h.bf16 %v4703_v52  ;;  %v5297_v14 = vld [vmem:[#allocation7 + $0x1b8] ss:$24 sps:$4 sm:$0xff]  }
  0x9e   : > { %4096 = vmatmul.mubr.bf16.gmra.mxu1 %v5291_v23  ;;  %4224 = vmatmul.mubr.bf16.gmra.mxu0 %v5292_v42  ;;  %v5293_v60 = vld [vmem:[#allocation7 + $0x1bc] ss:$24 sps:$4 sm:$0xff]   ;;  %v2283_v62 = vsel %vm200_vm0, %v2275_v38, %v2173_v47  ;;  %2442 = vst [vmem:[#allocation7 + $0x200] sm:$0xf] %v2439_v56  ;;  %v2167_v3 = vpack.c.bf16 %v5328_v44, %v2165_v57  ;;  %v2267_v4 = vrot.slane %v2266_v61, 7  ;;  %v2713_v12 = vunpack.c.l.bf16 %v6094_v59 }
  0x9f   : > { %2459 = vst [vmem:[#allocation7 + $0x204] sm:$0xf] %v2456_v43  ;;  %v2184_v2 = vpack.c.bf16 %v5328_v44, %v2182_v58  ;;  %v2284_v5 = vrot.slane %v2283_v62, 7  ;;  %4103 = vmatprep.mubr.bf16.mxu1 %v5293_v60  ;;  %v2565_v50 = vsel %vm200_vm0, %v2557_v63, %v2428_v35  ;;  %v2591_v11 = vsel %vm200_vm0, %v2583_v0, %v2445_v36  ;;  %v4711_v57 = vld [vmem:[%s5400_s13 + $0x238] sm:$0xff]  }
  0xa0   : > { %v2739_v13 = vunpack.c.h.bf16 %v6094_v59  ;;  %2170 = vst [vmem:[#allocation7 + $0x1c0] sm:$0xf] %v2167_v3  ;;  %v2269_v15 = vpack.c.bf16 %v5328_v44, %v2267_v4  ;;  %v2566_v19 = vrot.slane %v2565_v50, 7  ;;  %v2592_v20 = vrot.slane %v2591_v11, 7 }
  0xa1   : > { %2187 = vst [vmem:[#allocation7 + $0x1c4] sm:$0xf] %v2184_v2  ;;  %v2286_v8 = vpack.c.bf16 %v5328_v44, %v2284_v5  ;;  %v5298_v16 = vld [vmem:[#allocation7 + $0x190] ss:$24 sps:$4 sm:$0xff]   ;;  %v2721_v25 = vsel %vm200_vm0, %v2713_v12, %v2557_v63  ;;  %v2360_v21 = vunpack.c.l.bf16 %v4693_v7  ;;  %v2377_v22 = vunpack.c.h.bf16 %v4693_v7 }
  0xa2   : > { %v5295_v24 = vld [vmem:[#allocation7 + $0x194] ss:$24 sps:$4 sm:$0xff]   ;;  %v2747_v6 = vsel %vm200_vm0, %v2739_v13, %v2583_v0  ;;  %2272 = vst [vmem:[#allocation7 + $0x1d8] sm:$0xf] %v2269_v15  ;;  %v2568_v26 = vpack.c.bf16 %v5328_v44, %v2566_v19  ;;  %v2594_v9 = vpack.c.bf16 %v5328_v44, %v2592_v20  ;;  %v2722_v28 = vrot.slane %v2721_v25, 7 }
  0xa3   : > { %2289 = vst [vmem:[#allocation7 + $0x1dc] sm:$0xf] %v2286_v8  ;;  %v2748_v29 = vrot.slane %v2747_v6, 7  ;;  %4231 = vmatprep.mubr.bf16.mxu0 %v5295_v24  ;;  %v2368_v31 = vsel %vm200_vm0, %v2360_v21, %v2258_v55  ;;  %v2385_v33 = vsel %vm200_vm0, %v2377_v22, %v2275_v38  ;;  %v2462_v35 = vunpack.c.l.bf16 %v6108_v17  ;;  %v4717_v5 = vld [vmem:[%s5400_s13 + $0x250] sm:$0xff]   ;;  %s5145_s13 = smul.u32 200, %s6402_s18 }
  0xa4   : > { %v2479_v36 = vunpack.c.h.bf16 %v6108_v17  ;;  %2571 = vst [vmem:[#allocation7 + $0x218] sm:$0xf] %v2568_v26  ;;  %2597 = vst [vmem:[#allocation7 + $0x21c] sm:$0xf] %v2594_v9  ;;  %v2724_v23 = vpack.c.bf16 %v5328_v44, %v2722_v28  ;;  %v2369_v39 = vrot.slane %v2368_v31, 7  ;;  %v2386_v40 = vrot.slane %v2385_v33, 7 }
  0xa5   : > { %v2750_v32 = vpack.c.bf16 %v5328_v44, %v2748_v29  ;;  %v2470_v37 = vsel %vm200_vm0, %v2462_v35, %v2360_v21  ;;  %v2869_v18 = vunpack.c.l.bf16 %v4715_v30  ;;  %v2895_v45 = vunpack.c.h.bf16 %v4715_v30  ;;  %v5303_v54 = vld [vmem:[#allocation7 + $0x1e8] ss:$24 sps:$4 sm:$0xff]   ;;  %s6259_s25 = scalar_lea.vmem %s6400_s4, %s5145_s13 }
  0xa6   : > { %4104 = vmatmul.mubr.bf16.gmra.mxu1 %v5297_v14  ;;  %4232 = vmatmul.mubr.bf16.gmra.mxu0 %v5298_v16  ;;  %v5299_v27 = vld [vmem:[#allocation7 + $0x1ec] ss:$24 sps:$4 sm:$0xff]   ;;  %v2487_v42 = vsel %vm200_vm0, %v2479_v36, %v2377_v22  ;;  %2727 = vst [vmem:[#allocation7 + $0x230] sm:$0xf] %v2724_v23  ;;  %v2371_v46 = vpack.c.bf16 %v5328_v44, %v2369_v39  ;;  %v2471_v48 = vrot.slane %v2470_v37, 7  ;;  %v2609_v52 = vunpack.c.l.bf16 %v4705_v41 }
  0xa7   : > { %2753 = vst [vmem:[#allocation7 + $0x234] sm:$0xf] %v2750_v32  ;;  %v2388_v47 = vpack.c.bf16 %v5328_v44, %v2386_v40  ;;  %v2488_v51 = vrot.slane %v2487_v42, 7  ;;  %4111 = vmatprep.mubr.bf16.mxu1 %v5299_v27  ;;  %v2875_v34 = vsel %vm2822_vm1, %v2869_v18, %v5357_v1  ;;  %v2901_v49 = vsel %vm2822_vm1, %v2895_v45, %v5357_v1 }
  0xa8   : > { %v2635_v53 = vunpack.c.h.bf16 %v4705_v41  ;;  %2374 = vst [vmem:[#allocation7 + $0x1f0] sm:$0xf] %v2371_v46  ;;  %v2473_v55 = vpack.c.bf16 %v5328_v44, %v2471_v48  ;;  %v2877_v56 = vsel %vm200_vm0, %v2875_v34, %v2713_v12  ;;  %v2903_v43 = vsel %vm200_vm0, %v2901_v49, %v2739_v13 }
  0xa9   : > { %2391 = vst [vmem:[#allocation7 + $0x1f4] sm:$0xf] %v2388_v47  ;;  %v2490_v38 = vpack.c.bf16 %v5328_v44, %v2488_v51  ;;  %v5304_v59 = vld [vmem:[#allocation7 + $0x1c0] ss:$24 sps:$4 sm:$0xff]   ;;  %v2878_v60 = vrot.slane %v2877_v56, 7  ;;  %v2979_v61 = vsel %vm200_vm0, %v5357_v1, %v2875_v34  ;;  %v2987_v62 = vsel %vm200_vm0, %v5357_v1, %v2901_v49 }
  0xaa   : > { %v5301_v58 = vld [vmem:[#allocation7 + $0x1c4] ss:$24 sps:$4 sm:$0xff]   ;;  %v2617_v63 = vsel %vm200_vm0, %v2609_v52, %v2462_v35  ;;  %2476 = vst [vmem:[#allocation7 + $0x208] sm:$0xf] %v2473_v55  ;;  %v2904_v0 = vrot.slane %v2903_v43, 7  ;;  %v2980_v3 = vrot.slane %v2979_v61, 7  ;;  %v2643_v50 = vsel %vm200_vm0, %v2635_v53, %v2479_v36 }
  0xab   : > { %2493 = vst [vmem:[#allocation7 + $0x20c] sm:$0xf] %v2490_v38  ;;  %v2988_v2 = vrot.slane %v2987_v62, 7  ;;  %v2618_v4 = vrot.slane %v2617_v63, 7  ;;  %4239 = vmatprep.mubr.bf16.mxu0 %v5301_v58  ;;  %v2880_v7 = vpack.c.bf16 %v5328_v44, %v2878_v60  ;;  %v2765_v11 = vunpack.c.l.bf16 %v4711_v57 }
  0xac   : > { %v2791_v12 = vunpack.c.h.bf16 %v4711_v57  ;;  %v2906_v13 = vpack.c.bf16 %v5328_v44, %v2904_v0  ;;  %v2982_v14 = vpack.c.bf16 %v5328_v44, %v2980_v3  ;;  %v2644_v8 = vrot.slane %v2643_v50, 7 }
  0xad   : > { %v2990_v15 = vpack.c.bf16 %v5328_v44, %v2988_v2  ;;  %2883 = vst [vmem:[#allocation7 + $0x248] sm:$0xf] %v2880_v7  ;;  %v2620_v20 = vpack.c.bf16 %v5328_v44, %v2618_v4  ;;  %v2773_v17 = vsel %vm200_vm0, %v2765_v11, %v2609_v52  ;;  %v2921_v16 = vunpack.c.l.bf16 %v4717_v5  ;;  %v5309_v9 = vld [vmem:[#allocation7 + $0x218] ss:$24 sps:$4 sm:$0xff]  }
  0xae   : > { %4112 = vmatmul.mubr.bf16.gmra.mxu1 %v5303_v54  ;;  %4240 = vmatmul.mubr.bf16.gmra.mxu0 %v5304_v59  ;;  %v5305_v19 = vld [vmem:[#allocation7 + $0x21c] ss:$24 sps:$4 sm:$0xff]   ;;  %v2799_v24 = vsel %vm200_vm0, %v2791_v12, %v2635_v53  ;;  %2909 = vst [vmem:[#allocation7 + $0x24c] sm:$0xf] %v2906_v13  ;;  %2985 = vst [vmem:[#allocation7 + $0x260] sm:$0xf] %v2982_v14  ;;  %v2646_v25 = vpack.c.bf16 %v5328_v44, %v2644_v8  ;;  %v2947_v22 = vunpack.c.h.bf16 %v4717_v5 }
  0xaf   : > { %2993 = vst [vmem:[#allocation7 + $0x264] sm:$0xf] %v2990_v15  ;;  %v2774_v6 = vrot.slane %v2773_v17, 7  ;;  %v2800_v21 = vrot.slane %v2799_v24, 7  ;;  %4119 = vmatprep.mubr.bf16.mxu1 %v5305_v19  ;;  %2623 = vst [vmem:[#allocation7 + $0x220] sm:$0xf] %v2620_v20  ;;  %v2927_v26 = vsel %vm2822_vm1, %v2921_v16, %v5357_v1 }
  0xb0   : > { %2649 = vst [vmem:[#allocation7 + $0x224] sm:$0xf] %v2646_v25  ;;  %v2929_v30 = vsel %vm200_vm0, %v2927_v26, %v2765_v11  ;;  %v2953_v31 = vsel %vm2822_vm1, %v2947_v22, %v5357_v1  ;;  %v2995_v32 = vsel %vm200_vm0, %v5357_v1, %v2927_v26 }
  0xb1   : > { %v2776_v28 = vpack.c.bf16 %v5328_v44, %v2774_v6  ;;  %v2802_v29 = vpack.c.bf16 %v5328_v44, %v2800_v21  ;;  %v5310_v35 = vld [vmem:[#allocation7 + $0x1f0] ss:$24 sps:$4 sm:$0xff]   ;;  %v2930_v36 = vrot.slane %v2929_v30, 7  ;;  %v2955_v23 = vsel %vm200_vm0, %v2953_v31, %v2791_v12 }
  0xb2   : > { %v5307_v33 = vld [vmem:[#allocation7 + $0x1f4] ss:$24 sps:$4 sm:$0xff]   ;;  %v3003_v39 = vsel %vm200_vm0, %v5357_v1, %v2953_v31  ;;  %v2956_v40 = vrot.slane %v2955_v23, 7  ;;  %v2996_v41 = vrot.slane %v2995_v32, 7 }
  0xb3   : > { %2779 = vst [vmem:[#allocation7 + $0x238] sm:$0xf] %v2776_v28  ;;  %2805 = vst [vmem:[#allocation7 + $0x23c] sm:$0xf] %v2802_v29  ;;  %v3004_v27 = vrot.slane %v3003_v39, 7  ;;  %4247 = vmatprep.mubr.bf16.mxu0 %v5307_v33  ;;  %v2932_v10 = vpack.c.bf16 %v5328_v44, %v2930_v36 }
  0xb4   : > { %v2958_v37 = vpack.c.bf16 %v5328_v44, %v2956_v40  ;;  %v2998_v42 = vpack.c.bf16 %v5328_v44, %v2996_v41 }
  0xb5   : > { %v3006_v18 = vpack.c.bf16 %v5328_v44, %v3004_v27  ;;  %2935 = vst [vmem:[#allocation7 + $0x250] sm:$0xf] %v2932_v10  ;;  %v5315_v46 = vld [vmem:[#allocation7 + $0x248] ss:$24 sps:$4 sm:$0xff]  }
  0xb6   : > { %4120 = vmatmul.mubr.bf16.gmra.mxu1 %v5309_v9  ;;  %4248 = vmatmul.mubr.bf16.gmra.mxu0 %v5310_v35  ;;  %v5311_v45 = vld [vmem:[#allocation7 + $0x24c] ss:$24 sps:$4 sm:$0xff]   ;;  %2961 = vst [vmem:[#allocation7 + $0x254] sm:$0xf] %v2958_v37  ;;  %3001 = vst [vmem:[#allocation7 + $0x268] sm:$0xf] %v2998_v42 }
  0xb7   : > { %3009 = vst [vmem:[#allocation7 + $0x26c] sm:$0xf] %v3006_v18  ;;  %4127 = vmatprep.mubr.bf16.mxu1 %v5311_v45 }
  0xba   : > { %v5313_v47 = vld [vmem:[#allocation7 + $0x224] ss:$24 sps:$4 sm:$0xff]   ;;  %v5316_v48 = vld [vmem:[#allocation7 + $0x220] ss:$24 sps:$4 sm:$0xff]  }
  0xbb   : > { %4255 = vmatprep.mubr.bf16.mxu0 %v5313_v47 }
  0xbd   : > { %v5319_v34 = vld [vmem:[#allocation7 + $0x250] ss:$24 sps:$4 sm:$0xff]  }
  0xbe   : > { %4128 = vmatmul.mubr.bf16.gmra.mxu1 %v5315_v46  ;;  %4256 = vmatmul.mubr.bf16.gmra.mxu0 %v5316_v48  ;;  %v5317_v51 = vld [vmem:[#allocation7 + $0x254] ss:$24 sps:$4 sm:$0xff]  }
  0xbf   : > { %4263 = vmatprep.mubr.bf16.mxu0 %v5317_v51 }
  0xc6   : > { %4264 = vmatmul.mubr.bf16.gmra.mxu0 %v5319_v34 }
  0xee   : > { %v6170_v49 = vpop.f32.mrf.mxu0  ;;  %v4905_v53 = vpop.f32.mrf.mxu1 }
  0xf0   : > { %v6172_v52 = vpop.f32.mrf.mxu0  ;;  %v4906_v55 = vpop.f32.mrf.mxu1 }
  0xf1   : > { %v6178_v38 = vadd.f32 %v4906_v55, %v4905_v53 }
  0xf2   : > { %v6174_v44 = vpop.f32.mrf.mxu0  ;;  %v4908_v43 = vpop.f32.mrf.mxu1 }
  0xf4   : > { %v6176_v54 = vpop.f32.mrf.mxu0  ;;  %v4909_v58 = vpop.f32.mrf.mxu1 }
  0xf5   : > { %v6184_v59 = vadd.f32 %v4909_v58, %v4908_v43 }
  0xf6   : > { %v6180_v56 = vpop.f32.mrf.mxu0  ;;  %v4911_v61 = vpop.f32.mrf.mxu1 }
  0xf8   : > { %v6182_v57 = vpop.f32.mrf.mxu0  ;;  %v4912_v63 = vpop.f32.mrf.mxu1 }
  0xf9   : > { %v6190_v0 = vadd.f32 %v4912_v63, %v4911_v61 }
  0xfa   : > { %v6186_v60 = vpop.f32.mrf.mxu0  ;;  %v4914_v3 = vpop.f32.mrf.mxu1 }
  0xfc   : > { %v6188_v62 = vpop.f32.mrf.mxu0  ;;  %v4915_v4 = vpop.f32.mrf.mxu1 }
  0xfd   : > { %v6196_v7 = vadd.f32 %v4915_v4, %v4914_v3  ;;  %v4865_v4 = vadd.f32 %v6172_v52, %v6170_v49 }
  0xfe   : > { %v6192_v2 = vpop.f32.mrf.mxu0  ;;  %v4917_v50 = vpop.f32.mrf.mxu1 }
 0x100   : > { %v6194_v5 = vpop.f32.mrf.mxu0  ;;  %v4918_v12 = vpop.f32.mrf.mxu1 }
 0x101   : > { %v6202_v14 = vadd.f32 %v4918_v12, %v4917_v50 }
 0x102   : > { %v6198_v11 = vpop.f32.mrf.mxu0  ;;  %v4920_v15 = vpop.f32.mrf.mxu1 }
 0x104   : > { %v6200_v13 = vpop.f32.mrf.mxu0  ;;  %v4921_v19 = vpop.f32.mrf.mxu1 }
 0x105   : > { %v6208_v17 = vadd.f32 %v4921_v19, %v4920_v15 }
 0x106   : > { %v6204_v8 = vpop.f32.mrf.mxu0  ;;  %v4923_v24 = vpop.f32.mrf.mxu1 }
 0x108   : > { %v6206_v20 = vpop.f32.mrf.mxu0  ;;  %v4924_v25 = vpop.f32.mrf.mxu1 }
 0x109   : > { %v6214_v21 = vadd.f32 %v4924_v25, %v4923_v24  ;;  %v4271_v25 = vld [vmem:[%s6397_s1] sm:$0xff] }
 0x10a   : > { %v6210_v16 = vpop.f32.mrf.mxu0  ;;  %v4926_v22 = vpop.f32.mrf.mxu1 }
 0x10c   : > { %v6212_v6 = vpop.f32.mrf.mxu0  ;;  %v4927_v9 = vpop.f32.mrf.mxu1 }
 0x10d   : > { %v6220_v29 = vadd.f32 %v4927_v9, %v4926_v22 }
 0x10e   : > { %v6216_v26 = vpop.f32.mrf.mxu0  ;;  %v4929_v30 = vpop.f32.mrf.mxu1 }
 0x110   : > { %v6218_v28 = vpop.f32.mrf.mxu0  ;;  %v4930_v33 = vpop.f32.mrf.mxu1 }
 0x111   : > { %v6226_v36 = vadd.f32 %v4930_v33, %v4929_v30  ;;  %v4868_v30 = vadd.f32 %v6176_v54, %v6174_v44  ;;  %v4871_v54 = vadd.f32 %v6182_v57, %v6180_v56 }
 0x112   : > { %v6222_v31 = vpop.f32.mrf.mxu0  ;;  %v4932_v23 = vpop.f32.mrf.mxu1 }
 0x114   : > { %v6224_v35 = vpop.f32.mrf.mxu0  ;;  %v4933_v39 = vpop.f32.mrf.mxu1 }
 0x115   : > { %v6232_v41 = vadd.f32 %v4933_v39, %v4932_v23 }
 0x116   : > { %v6228_v32 = vpop.f32.mrf.mxu0  ;;  %v4935_v27 = vpop.f32.mrf.mxu1 }
 0x118   : > { %v6230_v40 = vpop.f32.mrf.mxu0  ;;  %v4936_v37 = vpop.f32.mrf.mxu1 }
 0x119   : > { %v6238_v18 = vadd.f32 %v4936_v37, %v4935_v27 }
 0x11a   : > { %v6234_v10 = vpop.f32.mrf.mxu0  ;;  %v4938_v45 = vpop.f32.mrf.mxu1 }
 0x11b   : > { %v4272_v45 = vld [vmem:[%s6397_s1 + $0x8] sm:$0xff] }
 0x11c   : > { %v6236_v42 = vpop.f32.mrf.mxu0  ;;  %v4939_v46 = vpop.f32.mrf.mxu1 }
 0x11e   : > { %v6240_v47 = vpop.f32.mrf.mxu0  ;;  %v4957_v51 = vpop.f32.mrf.mxu1 }
 0x120   : > { %v6242_v48 = vpop.f32.mrf.mxu0  ;;  %v4958_v53 = vpop.f32.mrf.mxu1 }
 0x121   : > { %v4959_v61 = vadd.f32 %v4958_v53, %v4957_v51 }
 0x122   : > { %v6244_v34 = vpop.f32.mrf.mxu0  ;;  %v4960_v55 = vpop.f32.mrf.mxu1 }
 0x123   : > { %v4034_v15 = vadd.f32 %v4959_v61, %v4865_v4  ;;  %v4273_v4 = vld [vmem:[%s6397_s1 + $0x10] sm:$0xff] }
 0x124   : > { %v6246_v43 = vpop.f32.mrf.mxu0  ;;  %v4961_v58 = vpop.f32.mrf.mxu1 }
 0x125   : > { %v4962_v19 = vadd.f32 %v4961_v58, %v4960_v55 }
 0x126   : > { %v4963_v63 = vpop.f32.mrf.mxu1  ;;  %v5051_v3 = vpop.f32.mrf.mxu0 }
 0x127   : > { %v4037_v23 = vadd.f32 %v4962_v19, %v4868_v30  ;;  %v4274_v30 = vld [vmem:[%s6397_s1 + $0x18] sm:$0xff] }
 0x128   : > { %v4964_v50 = vpop.f32.mrf.mxu1  ;;  %v5052_v12 = vpop.f32.mrf.mxu0 }
 0x129   : > { %v5053_v24 = vadd.f32 %v5052_v12, %v5051_v3  ;;  %v4965_v39 = vadd.f32 %v4964_v50, %v4963_v63 }
 0x12a   : > { %v4966_v22 = vpop.f32.mrf.mxu1  ;;  %v5054_v9 = vpop.f32.mrf.mxu0 }
 0x12b   : > { %v4170_v33 = vadd.f32 %v5053_v24, %v4034_v15  ;;  %v4042_v58 = vadd.f32 %v4965_v39, %v4871_v54  ;;  %v4874_v15 = vadd.f32 %v6188_v62, %v6186_v60 }
 0x12c   : > { %v4967_v49 = vpop.f32.mrf.mxu1  ;;  %v5055_v52 = vpop.f32.mrf.mxu0 }
 0x12d   : > { %v4296_v27 = vadd.f32 %v4271_v25, %v4170_v33  ;;  %v5056_v37 = vadd.f32 %v5055_v52, %v5054_v9  ;;  %v4968_v61 = vadd.f32 %v4967_v49, %v4966_v22  ;;  %v4877_v52 = vadd.f32 %v6194_v5, %v6192_v2 }
 0x12e   : > { %v4969_v46 = vpop.f32.mrf.mxu1  ;;  %v5057_v44 = vpop.f32.mrf.mxu0 }
 0x12f   : > { %4321 = vst [vmem:[%s6259_s25] sm:$0xff] %v4296_v27  ;;  %v4173_v51 = vadd.f32 %v5056_v37, %v4037_v23  ;;  %v4045_v24 = vadd.f32 %v4968_v61, %v4874_v15 }
 0x130   : > { %v4970_v53 = vpop.f32.mrf.mxu1  ;;  %v5058_v55 = vpop.f32.mrf.mxu0 }
 0x131   : > { %v4297_v3 = vadd.f32 %v4272_v45, %v4173_v51  ;;  %v5059_v63 = vadd.f32 %v5058_v55, %v5057_v44  ;;  %v4971_v25 = vadd.f32 %v4970_v53, %v4969_v46  ;;  %v4275_v46 = vld [vmem:[%s6397_s1 + $0x20] sm:$0xff]  ;;  %v4880_v51 = vadd.f32 %v6200_v13, %v6198_v11 }
 0x132   : > { %v4972_v50 = vpop.f32.mrf.mxu1  ;;  %v5060_v12 = vpop.f32.mrf.mxu0 }
 0x133   : > { %4322 = vst [vmem:[%s6259_s25 + $0x8] sm:$0xff] %v4297_v3  ;;  %v4178_v56 = vadd.f32 %v5059_v63, %v4042_v58  ;;  %v4050_v39 = vadd.f32 %v4971_v25, %v4877_v52  ;;  %v4276_v63 = vld [vmem:[%s6397_s1 + $0x28] sm:$0xff]  ;;  %v4277_v25 = vld [vmem:[%s6397_s1 + $0x30] sm:$0xff] }
 0x134   : > { %v4973_v57 = vpop.f32.mrf.mxu1  ;;  %v5061_v19 = vpop.f32.mrf.mxu0 }
 0x135   : > { %v4298_v9 = vadd.f32 %v4273_v4, %v4178_v56  ;;  %v5062_v22 = vadd.f32 %v5061_v19, %v5060_v12  ;;  %v4974_v27 = vadd.f32 %v4973_v57, %v4972_v50  ;;  %v4883_v12 = vadd.f32 %v6206_v20, %v6204_v8 }
 0x136   : > { %v4975_v33 = vpop.f32.mrf.mxu1  ;;  %v5063_v49 = vpop.f32.mrf.mxu0 }
 0x137   : > { %4323 = vst [vmem:[%s6259_s25 + $0x10] sm:$0xff] %v4298_v9  ;;  %v4181_v60 = vadd.f32 %v5062_v22, %v4045_v24  ;;  %v4053_v55 = vadd.f32 %v4974_v27, %v4880_v51 }
 0x138   : > { %v4976_v62 = vpop.f32.mrf.mxu1  ;;  %v5064_v23 = vpop.f32.mrf.mxu0 }
 0x139   : > { %v4299_v37 = vadd.f32 %v4274_v30, %v4181_v60  ;;  %v5065_v45 = vadd.f32 %v5064_v23, %v5063_v49  ;;  %v4977_v58 = vadd.f32 %v4976_v62, %v4975_v33  ;;  %v4886_v30 = vadd.f32 %v6212_v6, %v6210_v16  ;;  %v4278_v23 = vld [vmem:[%s6397_s1 + $0x38] sm:$0xff] }
 0x13a   : > { %v4978_v44 = vpop.f32.mrf.mxu1  ;;  %v5066_v54 = vpop.f32.mrf.mxu0 }
 0x13b   : > { %4324 = vst [vmem:[%s6259_s25 + $0x18] sm:$0xff] %v4299_v37  ;;  %v4186_v2 = vadd.f32 %v5065_v45, %v4050_v39  ;;  %v4058_v56 = vadd.f32 %v4977_v58, %v4883_v12  ;;  %v4889_v37 = vadd.f32 %v6218_v28, %v6216_v26 }
 0x13c   : > { %v4979_v5 = vpop.f32.mrf.mxu1  ;;  %v5067_v53 = vpop.f32.mrf.mxu0 }
 0x13d   : > { %v4300_v61 = vadd.f32 %v4275_v46, %v4186_v2  ;;  %v5068_v3 = vadd.f32 %v5067_v53, %v5066_v54  ;;  %v4980_v57 = vadd.f32 %v4979_v5, %v4978_v44  ;;  %v4279_v2 = vld [vmem:[%s6397_s1 + $0x40] sm:$0xff] }
 0x13e   : > { %v4981_v4 = vpop.f32.mrf.mxu1  ;;  %v5069_v50 = vpop.f32.mrf.mxu0 }
 0x13f   : > { %4325 = vst [vmem:[%s6259_s25 + $0x20] sm:$0xff] %v4300_v61  ;;  %v4189_v11 = vadd.f32 %v5068_v3, %v4053_v55  ;;  %v4061_v49 = vadd.f32 %v4980_v57, %v4886_v30  ;;  %v4892_v55 = vadd.f32 %v6224_v35, %v6222_v31  ;;  %v4898_v30 = vadd.f32 %v6236_v42, %v6234_v10 }
 0x140   : > { %v4982_v13 = vpop.f32.mrf.mxu1  ;;  %v5070_v15 = vpop.f32.mrf.mxu0 }
 0x141   : > { %v4301_v19 = vadd.f32 %v4276_v63, %v4189_v11  ;;  %v5071_v24 = vadd.f32 %v5070_v15, %v5069_v50  ;;  %v4983_v52 = vadd.f32 %v4982_v13, %v4981_v4  ;;  %v4280_v50 = vld [vmem:[%s6397_s1 + $0x48] sm:$0xff]  ;;  %v4895_v13 = vadd.f32 %v6230_v40, %v6228_v32 }
 0x142   : > { %v4984_v9 = vpop.f32.mrf.mxu1  ;;  %v5072_v22 = vpop.f32.mrf.mxu0 }
 0x143   : > { %4326 = vst [vmem:[%s6259_s25 + $0x28] sm:$0xff] %v4301_v19  ;;  %v4194_v8 = vadd.f32 %v5071_v24, %v4058_v56  ;;  %v4066_v46 = vadd.f32 %v4983_v52, %v4889_v37 }
 0x144   : > { %v4985_v20 = vpop.f32.mrf.mxu1  ;;  %v5073_v33 = vpop.f32.mrf.mxu0 }
 0x145   : > { %v4302_v60 = vadd.f32 %v4277_v25, %v4194_v8  ;;  %v5074_v62 = vadd.f32 %v5073_v33, %v5072_v22  ;;  %v4986_v44 = vadd.f32 %v4985_v20, %v4984_v9  ;;  %v4281_v25 = vld [vmem:[%s6397_s1 + $0x50] sm:$0xff] }
 0x146   : > { %v4987_v39 = vpop.f32.mrf.mxu1  ;;  %v5075_v27 = vpop.f32.mrf.mxu0 }
 0x147   : > { %4327 = vst [vmem:[%s6259_s25 + $0x30] sm:$0xff] %v4302_v60  ;;  %v4197_v16 = vadd.f32 %v5074_v62, %v4061_v49  ;;  %v4069_v61 = vadd.f32 %v4986_v44, %v4892_v55  ;;  %v4282_v60 = vld [vmem:[%s6397_s1 + $0x58] sm:$0xff] }
 0x148   : > { %v4988_v6 = vpop.f32.mrf.mxu1  ;;  %v5076_v45 = vpop.f32.mrf.mxu0 }
 0x149   : > { %v4303_v54 = vadd.f32 %v4278_v23, %v4197_v16  ;;  %v5077_v51 = vadd.f32 %v5076_v45, %v5075_v27  ;;  %v4989_v3 = vadd.f32 %v4988_v6, %v4987_v39  ;;  %v4901_v39 = vadd.f32 %v6242_v48, %v6240_v47 }
 0x14a   : > { %v4990_v5 = vpop.f32.mrf.mxu1  ;;  %v5078_v53 = vpop.f32.mrf.mxu0 }
 0x14b   : > { %4328 = vst [vmem:[%s6259_s25 + $0x38] sm:$0xff] %v4303_v54  ;;  %v4202_v26 = vadd.f32 %v5077_v51, %v4066_v46  ;;  %v4074_v56 = vadd.f32 %v4989_v3, %v4895_v13  ;;  %v4283_v46 = vld [vmem:[%s6397_s1 + $0x60] sm:$0xff]  ;;  %v4904_v51 = vadd.f32 %v6246_v43, %v6244_v34 }
 0x14c   : > { %v4991_v28 = vpop.f32.mrf.mxu1  ;;  %v5079_v58 = vpop.f32.mrf.mxu0 }
 0x14d   : > { %v4304_v63 = vadd.f32 %v4279_v2, %v4202_v26  ;;  %v5080_v4 = vadd.f32 %v5079_v58, %v5078_v53  ;;  %v4992_v57 = vadd.f32 %v4991_v28, %v4990_v5  ;;  %v4284_v28 = vld [vmem:[%s6397_s1 + $0x68] sm:$0xff] }
 0x14e   : > { %v4993_v12 = vpop.f32.mrf.mxu1  ;;  %v5081_v11 = vpop.f32.mrf.mxu0 }
 0x14f   : > { %4329 = vst [vmem:[%s6259_s25 + $0x40] sm:$0xff] %v4304_v63  ;;  %v4205_v31 = vadd.f32 %v5080_v4, %v4069_v61  ;;  %v4077_v20 = vadd.f32 %v4992_v57, %v4898_v30 }
 0x150   : > { %v4994_v35 = vpop.f32.mrf.mxu1  ;;  %v5082_v15 = vpop.f32.mrf.mxu0 }
 0x151   : > { %v4305_v19 = vadd.f32 %v4280_v50, %v4205_v31  ;;  %v5083_v24 = vadd.f32 %v5082_v15, %v5081_v11  ;;  %v4995_v33 = vadd.f32 %v4994_v35, %v4993_v12  ;;  %v4285_v11 = vld [vmem:[%s6397_s1 + $0x70] sm:$0xff] }
 0x152   : > { %v4996_v9 = vpop.f32.mrf.mxu1  ;;  %v5084_v22 = vpop.f32.mrf.mxu0 }
 0x153   : > { %4330 = vst [vmem:[%s6259_s25 + $0x48] sm:$0xff] %v4305_v19  ;;  %v4210_v32 = vadd.f32 %v5083_v24, %v4074_v56  ;;  %v4082_v37 = vadd.f32 %v4995_v33, %v4901_v39 }
 0x154   : > { %v4997_v40 = vpop.f32.mrf.mxu1  ;;  %v5085_v8 = vpop.f32.mrf.mxu0 }
 0x155   : > { %v4306_v49 = vadd.f32 %v4281_v25, %v4210_v32  ;;  %v5086_v52 = vadd.f32 %v5085_v8, %v5084_v22  ;;  %v4998_v16 = vadd.f32 %v4997_v40, %v4996_v9  ;;  %v4286_v25 = vld [vmem:[%s6397_s1 + $0x78] sm:$0xff] }
 0x156   : > { %v4999_v62 = vpop.f32.mrf.mxu1  ;;  %v5087_v23 = vpop.f32.mrf.mxu0 }
 0x157   : > { %4331 = vst [vmem:[%s6259_s25 + $0x50] sm:$0xff] %v4306_v49  ;;  %v4213_v10 = vadd.f32 %v5086_v52, %v4077_v20  ;;  %v4085_v5 = vadd.f32 %v4998_v16, %v4904_v51  ;;  %v4287_v49 = vld [vmem:[%s6397_s1 + $0x80] sm:$0xff] }
 0x158   : > { %v5000_v42 = vpop.f32.mrf.mxu1  ;;  %v5088_v27 = vpop.f32.mrf.mxu0 }
 0x159   : > { %v4307_v6 = vadd.f32 %v4282_v60, %v4213_v10  ;;  %v5089_v45 = vadd.f32 %v5088_v27, %v5087_v23  ;;  %v5001_v53 = vadd.f32 %v5000_v42, %v4999_v62 }
 0x15a   : > { %v5002_v44 = vpop.f32.mrf.mxu1  ;;  %v5090_v54 = vpop.f32.mrf.mxu0 }
 0x15b   : > { %4332 = vst [vmem:[%s6259_s25 + $0x58] sm:$0xff] %v4307_v6  ;;  %v4218_v47 = vadd.f32 %v5089_v45, %v4082_v37  ;;  %v4090_v34 = vadd.f32 %v5001_v53, %v6178_v38  ;;  %v4288_v37 = vld [vmem:[%s6397_s1 + $0x88] sm:$0xff] }
 0x15c   : > { %v5003_v48 = vpop.f32.mrf.mxu1  ;;  %v5091_v2 = vpop.f32.mrf.mxu0 }
 0x15d   : > { %v4308_v55 = vadd.f32 %v4283_v46, %v4218_v47  ;;  %v5092_v26 = vadd.f32 %v5091_v2, %v5090_v54  ;;  %v5004_v43 = vadd.f32 %v5003_v48, %v5002_v44  ;;  %v4289_v48 = vld [vmem:[%s6397_s1 + $0x90] sm:$0xff] }
 0x15e   : > { %v5005_v58 = vpop.f32.mrf.mxu1  ;;  %v5093_v61 = vpop.f32.mrf.mxu0 }
 0x15f   : > { %4333 = vst [vmem:[%s6259_s25 + $0x60] sm:$0xff] %v4308_v55  ;;  %v4221_v3 = vadd.f32 %v5092_v26, %v4085_v5  ;;  %v4093_v57 = vadd.f32 %v5004_v43, %v6184_v59 }
 0x160   : > { %v5006_v63 = vpop.f32.mrf.mxu1  ;;  %v5094_v4 = vpop.f32.mrf.mxu0 }
 0x161   : > { %v4309_v50 = vadd.f32 %v4284_v28, %v4221_v3  ;;  %v5095_v12 = vadd.f32 %v5094_v4, %v5093_v61  ;;  %v5007_v19 = vadd.f32 %v5006_v63, %v5005_v58  ;;  %v4290_v3 = vld [vmem:[%s6397_s1 + $0x98] sm:$0xff] }
 0x162   : > { %v5008_v13 = vpop.f32.mrf.mxu1  ;;  %v5096_v31 = vpop.f32.mrf.mxu0 }
 0x163   : > { %4334 = vst [vmem:[%s6259_s25 + $0x68] sm:$0xff] %v4309_v50  ;;  %v4226_v35 = vadd.f32 %v5095_v12, %v4090_v34  ;;  %v4098_v8 = vadd.f32 %v5007_v19, %v6190_v0 }
 0x164   : > { %v5009_v15 = vpop.f32.mrf.mxu1  ;;  %v5097_v56 = vpop.f32.mrf.mxu0 }
 0x165   : > { %v4310_v24 = vadd.f32 %v4285_v11, %v4226_v35  ;;  %v5098_v38 = vadd.f32 %v5097_v56, %v5096_v31  ;;  %v5010_v20 = vadd.f32 %v5009_v15, %v5008_v13  ;;  %v4291_v31 = vld [vmem:[%s6397_s1 + $0xa0] sm:$0xff] }
 0x166   : > { %v5011_v9 = vpop.f32.mrf.mxu1  ;;  %v5099_v22 = vpop.f32.mrf.mxu0 }
 0x167   : > { %4335 = vst [vmem:[%s6259_s25 + $0x70] sm:$0xff] %v4310_v24  ;;  %v4229_v30 = vadd.f32 %v5098_v38, %v4093_v57  ;;  %v4101_v10 = vadd.f32 %v5010_v20, %v6196_v7 }
 0x168   : > { %v5012_v32 = vpop.f32.mrf.mxu1  ;;  %v5100_v40 = vpop.f32.mrf.mxu0 }
 0x169   : > { %v4311_v33 = vadd.f32 %v4286_v25, %v4229_v30  ;;  %v5101_v59 = vadd.f32 %v5100_v40, %v5099_v22  ;;  %v5013_v42 = vadd.f32 %v5012_v32, %v5011_v9  ;;  %v4292_v9 = vld [vmem:[%s6397_s1 + $0xa8] sm:$0xff] }
 0x16a   : > { %v5014_v52 = vpop.f32.mrf.mxu1  ;;  %v5102_v60 = vpop.f32.mrf.mxu0 }
 0x16b   : > { %4336 = vst [vmem:[%s6259_s25 + $0x78] sm:$0xff] %v4311_v33  ;;  %v4234_v62 = vadd.f32 %v5101_v59, %v4098_v8  ;;  %v4106_v54 = vadd.f32 %v5013_v42, %v6202_v14 }
 0x16c   : > { %v5015_v23 = vpop.f32.mrf.mxu1  ;;  %v5103_v39 = vpop.f32.mrf.mxu0 }
 0x16d   : > { %v4312_v27 = vadd.f32 %v4287_v49, %v4234_v62  ;;  %v5104_v0 = vadd.f32 %v5103_v39, %v5102_v60  ;;  %v5016_v51 = vadd.f32 %v5015_v23, %v5014_v52  ;;  %v4293_v49 = vld [vmem:[%s6397_s1 + $0xb0] sm:$0xff] }
 0x16e   : > { %v5017_v16 = vpop.f32.mrf.mxu1  ;;  %v5105_v6 = vpop.f32.mrf.mxu0 }
 0x16f   : > { %4337 = vst [vmem:[%s6259_s25 + $0x80] sm:$0xff] %v4312_v27  ;;  %v4237_v45 = vadd.f32 %v5104_v0, %v4101_v10  ;;  %v4109_v28 = vadd.f32 %v5016_v51, %v6208_v17  ;;  %v4294_v0 = vld [vmem:[%s6397_s1 + $0xb8] sm:$0xff] }
 0x170   : > { %v5018_v46 = vpop.f32.mrf.mxu1  ;;  %v5106_v44 = vpop.f32.mrf.mxu0 }
 0x171   : > { %v4313_v47 = vadd.f32 %v4288_v37, %v4237_v45  ;;  %v5107_v7 = vadd.f32 %v5106_v44, %v5105_v6  ;;  %v5019_v58 = vadd.f32 %v5018_v46, %v5017_v16 }
 0x172   : > { %v5020_v2 = vpop.f32.mrf.mxu1  ;;  %v5108_v5 = vpop.f32.mrf.mxu0 }
 0x173   : > { %4338 = vst [vmem:[%s6259_s25 + $0x88] sm:$0xff] %v4313_v47  ;;  %v4242_v53 = vadd.f32 %v5107_v7, %v4106_v54  ;;  %v4114_v12 = vadd.f32 %v5019_v58, %v6214_v21 }
 0x174   : > { %v5021_v55 = vpop.f32.mrf.mxu1  ;;  %v5109_v26 = vpop.f32.mrf.mxu0 }
 0x175   : > { %v4314_v61 = vadd.f32 %v4289_v48, %v4242_v53  ;;  %v5110_v14 = vadd.f32 %v5109_v26, %v5108_v5  ;;  %v5022_v11 = vadd.f32 %v5021_v55, %v5020_v2 }
 0x176   : > { %v5023_v63 = vpop.f32.mrf.mxu1  ;;  %v5111_v4 = vpop.f32.mrf.mxu0 }
 0x177   : > { %4339 = vst [vmem:[%s6259_s25 + $0x90] sm:$0xff] %v4314_v61  ;;  %v4245_v34 = vadd.f32 %v5110_v14, %v4109_v28  ;;  %v4117_v24 = vadd.f32 %v5022_v11, %v6220_v29 }
 0x178   : > { %v5024_v43 = vpop.f32.mrf.mxu1  ;;  %v5112_v50 = vpop.f32.mrf.mxu0 }
 0x179   : > { %v4315_v13 = vadd.f32 %v4290_v3, %v4245_v34  ;;  %v5113_v17 = vadd.f32 %v5112_v50, %v5111_v4  ;;  %v5025_v38 = vadd.f32 %v5024_v43, %v5023_v63 }
 0x17a   : > { %v5026_v35 = vpop.f32.mrf.mxu1  ;;  %v5114_v15 = vpop.f32.mrf.mxu0 }
 0x17b   : > { %4340 = vst [vmem:[%s6259_s25 + $0x98] sm:$0xff] %v4315_v13  ;;  %v4250_v56 = vadd.f32 %v5113_v17, %v4114_v12  ;;  %v4122_v20 = vadd.f32 %v5025_v38, %v6226_v36 }
 0x17c   : > { %v5027_v57 = vpop.f32.mrf.mxu1  ;;  %v5115_v19 = vpop.f32.mrf.mxu0 }
 0x17d   : > { %v4316_v25 = vadd.f32 %v4291_v31, %v4250_v56  ;;  %v5116_v21 = vadd.f32 %v5115_v19, %v5114_v15  ;;  %v5028_v33 = vadd.f32 %v5027_v57, %v5026_v35 }
 0x17e   : > { %v5029_v22 = vpop.f32.mrf.mxu1  ;;  %v5117_v30 = vpop.f32.mrf.mxu0 }
 0x17f   : > { %4341 = vst [vmem:[%s6259_s25 + $0xa0] sm:$0xff] %v4316_v25  ;;  %v4253_v32 = vadd.f32 %v5116_v21, %v4117_v24  ;;  %v4125_v10 = vadd.f32 %v5028_v33, %v6232_v41  ;;  %v4295_v41 = vld [vmem:[%s6397_s1 + $0xc0] sm:$0x1f] }
 0x180   : > { %v5030_v40 = vpop.f32.mrf.mxu1  ;;  %v5118_v8 = vpop.f32.mrf.mxu0 }
 0x181   : > { %v4317_v59 = vadd.f32 %v4292_v9, %v4253_v32  ;;  %v5119_v29 = vadd.f32 %v5118_v8, %v5117_v30  ;;  %v5031_v42 = vadd.f32 %v5030_v40, %v5029_v22 }
 0x182   : > { %v5120_v52 = vpop.f32.mrf.mxu0  ;;  %v5032_v60 = vpop.f32.mrf.mxu1 }
 0x183   : > { %4342 = vst [vmem:[%s6259_s25 + $0xa8] sm:$0xff] %v4317_v59  ;;  %v4258_v62 = vadd.f32 %v5119_v29, %v4122_v20  ;;  %v4130_v45 = vadd.f32 %v5031_v42, %v6238_v18 }
 0x184   : > { %v5121_v23 = vpop.f32.mrf.mxu0  ;;  %v5033_v39 = vpop.f32.mrf.mxu1 }
 0x185   : > { %v4318_v27 = vadd.f32 %v4293_v49, %v4258_v62  ;;  %v5122_v36 = vadd.f32 %v5121_v23, %v5120_v52 }
 0x186   : > { %v5123_v37 = vpop.f32.mrf.mxu0 }
 0x187   : > { %4343 = vst [vmem:[%s6259_s25 + $0xb0] sm:$0xff] %v4318_v27  ;;  %v4261_v16 = vadd.f32 %v5122_v36, %v4125_v10 }
 0x188   : > { %v5124_v6 = vpop.f32.mrf.mxu0 }
 0x189   : > { %v4319_v46 = vadd.f32 %v4294_v0, %v4261_v16  ;;  %v5125_v44 = vadd.f32 %v5124_v6, %v5123_v37 }
 0x18a   : > { %v5126_v54 = vpop.f32.mrf.mxu0 }
 0x18b   : > { %4344 = vst [vmem:[%s6259_s25 + $0xb8] sm:$0xff] %v4319_v46  ;;  %v4266_v51 = vadd.f32 %v5125_v44, %v4130_v45 }
 0x18c   : > { %v5127_v47 = vpop.f32.mrf.mxu0 }
 0x18d   : > { %v4320_v7 = vadd.f32 %v4295_v41, %v4266_v51 }
 0x18f   : > { %4345 = vst [vmem:[%s6259_s25 + $0xc0] sm:$0x1f] %v4320_v7 }
 0x190 PF: > { %s19_s17 = sadd.s32 1, %s5326_s17  }
 0x191   : > { %p16_p4 = scmp.ge.s32.totalorder %s19_s17, 4  }
 0x193   :  { %18 = sbr.rel (!%p16_p4) target bundleno = 3 (0x3), region = 372 }

</bundles_post_ra>
